<compile_context>
chip_gen: v5e
topology: v5e:2x2
jax: 0.10.0
libtpu: 0.0.40
codegen_flags: <defaults>
</compile_context>

<pallas_src>
import functools

import numpy as np
import jax
import jax.numpy as jnp
from jax.experimental import pallas as pl
from jax.experimental.pallas import tpu as pltpu

# ---------------------------------------------------------------------------
# Model geometry (fixed by the PyTorch spec: input is (B, 2, 14, 14)).
# ---------------------------------------------------------------------------
IN_CH = 2
C1, K1 = 32, 5
C2, K2 = 64, 3
H_IN = 14
H_PAD = H_IN + 2                # 16  padded input side (padding=1)
H1 = H_IN + 2 - K1 + 1          # 12  conv1 output
P1 = H1 // 2                    # 6   after pool1
H2 = P1 + 2 - K2 + 1            # 6   conv2 output (padding=1)
P2 = H2 // 2                    # 3   after pool2
N_FLAT = C2 * P2 * P2           # 576
N_HID = 200
N_CLS = 32                      # ConvNet n_classes inside Baseline
K1_FEAT = K1 * K1 * IN_CH       # 50  conv1 im2col K
K1_PAD = 64                     # pad conv1 K for aligned MXU feed
K2_FEAT = K2 * K2 * C1          # 288 conv2 im2col K
N_HID_PAD = 256                 # pad fc1 width to a multiple of 128

_VMEM = pl.BlockSpec(memory_space=pltpu.MemorySpace.VMEM)


# ---------------------------------------------------------------------------
# Fused Pallas kernel: entire Baseline forward, everything VMEM-resident.
# ---------------------------------------------------------------------------
def _baseline_kernel(
    patches_ref,                 # (4*B*36, K1_PAD) bf16  conv1 im2col, pool-phase-grouped rows
    w1_ref, b1_ref,              # (K1_PAD, C1) bf16, (1, C1) f32
    g_ref,                       # (9*B*36, B*36)   bf16  stacked 0/1 conv2 tap gather
    w2_ref, b2_ref,              # (288, C2) bf16, (1, C2) f32
    wfc1_ref, bfc1_ref,          # (576, 256) bf16, (1, 256) f32
    wfc2_ref, bfc2_ref,          # (256, N_CLS) bf16, (1, N_CLS) f32
    wh1_ref, bh1_ref,            # (N_CLS, 64) f32, (1, 64) f32
    wh2_ref, bh2_ref,            # (64, 2) f32, (1, 2) f32
    out_ref,                     # (B, 2) f32
    im2_ref,                     # scratch (B*36, 288) bf16  conv2 im2col slab
    flat_ref,                    # scratch (B, 576) bf16     CHW-flattened pool2
    *, batch):
  f32 = jnp.float32
  bf16 = jnp.bfloat16
  n1 = batch * P1 * P1           # 72  pool1 rows (= conv2 output rows)
  n2 = batch * P2 * P2           # 18  pool2 rows

  # ---- conv1: one bf16 MXU matmul + bias + ReLU -----------------------------
  y1 = jnp.dot(patches_ref[...], w1_ref[...], preferred_element_type=f32)
  y1 = jnp.maximum(y1 + b1_ref[...], 0.0)                    # (4*n1, C1) f32

  # ---- pool1 2x2: rows are [phase00 | phase01 | phase10 | phase11] ----------
  pool1 = jnp.maximum(
      jnp.maximum(y1[0 * n1:1 * n1], y1[1 * n1:2 * n1]),
      jnp.maximum(y1[2 * n1:3 * n1], y1[3 * n1:4 * n1]))     # (n1, C1) f32

  # ---- conv2 tap gather: ONE stacked matmul, then 9 static lane stores ------
  t = jnp.dot(g_ref[...], pool1.astype(bf16), preferred_element_type=f32)
  for k in range(K2 * K2):                                   # unrolled at trace time
    im2_ref[:, k * C1:(k + 1) * C1] = t[k * n1:(k + 1) * n1, :].astype(bf16)

  # ---- conv2: one (n1, 288) @ (288, 64) matmul + bias + ReLU ----------------
  y2 = jnp.dot(im2_ref[...], w2_ref[...], preferred_element_type=f32)
  y2 = jnp.maximum(y2 + b2_ref[...], 0.0)                    # phase-grouped rows

  # ---- pool2 2x2: elementwise max over the 4 phase row-blocks ---------------
  pool2 = jnp.maximum(
      jnp.maximum(y2[0 * n2:1 * n2], y2[1 * n2:2 * n2]),
      jnp.maximum(y2[2 * n2:3 * n2], y2[3 * n2:4 * n2]))     # (n2, C2), rows (s, b)

  # ---- CHW flatten (weights pre-permuted): 9 static lane stores -------------
  for s in range(P2 * P2):
    flat_ref[:, s * C2:(s + 1) * C2] = (
        pool2[s * batch:(s + 1) * batch, :].astype(bf16))

  # ---- fc1 (576 -> 200, padded 256): ONE matmul + bias + ReLU ---------------
  h = jnp.dot(flat_ref[...], wfc1_ref[...], preferred_element_type=f32)
  h = jnp.maximum(h + bfc1_ref[...], 0.0)                    # (B, 256)

  # ---- fc2 (ConvNet output, 200 -> 32, no activation inside ConvNet) --------
  c = jnp.dot(h.astype(bf16), wfc2_ref[...], preferred_element_type=f32)
  c = c + bfc2_ref[...]

  # ---- Baseline.dense: ReLU -> 32->64 -> ReLU -> 64->2 -> Softmax -----------
  c = jnp.maximum(c, 0.0)
  d = jnp.dot(c, wh1_ref[...], preferred_element_type=f32) + bh1_ref[...]
  d = jnp.maximum(d, 0.0)
  logits = jnp.dot(d, wh2_ref[...], preferred_element_type=f32) + bh2_ref[...]

  m = jnp.max(logits, axis=-1, keepdims=True)
  e = jnp.exp(logits - m)
  out_ref[...] = (e / jnp.sum(e, axis=-1, keepdims=True)).astype(out_ref.dtype)


# ---------------------------------------------------------------------------
# One-time constants (numpy, built at trace/prepare time).
# ---------------------------------------------------------------------------
@functools.lru_cache(maxsize=None)
def _conv1_indices(batch):
  """Flat gather indices into padded NHWC input for conv1 im2col.
  Row order: [phase(0,0)|phase(0,1)|phase(1,0)|phase(1,1)], each block (b,oh,ow)
  over the 6x6 pooled grid.  Feature order: (kh, kw, ci)."""
  B = batch
  idx = np.zeros((4 * B * P1 * P1, K1_FEAT), np.int32)
  for pi in range(2):
    for pj in range(2):
      ph_idx = pi * 2 + pj
      for b in range(B):
        for oh in range(P1):
          for ow in range(P1):
            r = ph_idx * (B * P1 * P1) + b * (P1 * P1) + oh * P1 + ow
            oh_f, ow_f = 2 * oh + pi, 2 * ow + pj
            for kh in range(K1):
              for kw in range(K1):
                for ci in range(IN_CH):
                  f = (kh * K1 + kw) * IN_CH + ci
                  idx[r, f] = ((b * H_PAD + oh_f + kh) * H_PAD
                               + (ow_f + kw)) * IN_CH + ci
  return idx


@functools.lru_cache(maxsize=None)
def _build_gather(batch):
  """Stacked conv2 tap-gather matrix (9*B*36, B*36).
  Row index = k*(B*36) + r_out, with k = (di,dj) tap and conv2 output rows
  r_out grouped by pool2 phase (pi,pj), then (s = ph*3+pw, b)."""
  B = batch
  n_out = B * H2 * H2
  G = np.zeros((K2 * K2 * n_out, B * P1 * P1), np.float32)
  for di in range(K2):
    for dj in range(K2):
      k = di * K2 + dj
      for pi in range(2):
        for pj in range(2):
          ph_idx = pi * 2 + pj
          for ph in range(P2):
            for pw in range(P2):
              for b in range(B):
                h2, w2 = 2 * ph + pi, 2 * pw + pj
                h1, w1 = h2 + di - 1, w2 + dj - 1
                if 0 <= h1 < P1 and 0 <= w1 < P1:
                  r_out = ph_idx * (B * P2 * P2) + (ph * P2 + pw) * B + b
                  r_in = b * (P1 * P1) + h1 * P1 + w1
                  G[k * n_out + r_out, r_in] = 1.0
  return G


# ---------------------------------------------------------------------------
# Input-dependent wrapper glue: conv1 im2col via a single precomputed gather.
# ---------------------------------------------------------------------------
def _conv1_patches(x_nchw):
  """(B, 2, 14, 14) NCHW -> (4*B*36, K1_PAD) bf16 pool-phase-grouped patches."""
  B = x_nchw.shape[0]
  x = jnp.transpose(x_nchw, (0, 2, 3, 1))                       # NHWC (B,14,14,2)
  xp = jnp.pad(x, ((0, 0), (1, 1), (1, 1), (0, 0)))             # (B,16,16,2)
  idx = jnp.asarray(_conv1_indices(B))                          # (4*B*36, 50)
  pats = jnp.take(xp.reshape(-1), idx, axis=0)                  # one XLA gather
  pats = jnp.pad(pats, ((0, 0), (0, K1_PAD - K1_FEAT)))
  return pats.astype(jnp.bfloat16)


# ---------------------------------------------------------------------------
# Parameters (torch-convention layouts) and their one-time kernel re-layout.
# ---------------------------------------------------------------------------
def init_params(key):
  """Deterministic synthetic parameters in the torch module's layouts."""
  ks = jax.random.split(key, 12)
  sc = 0.05
  n = lambda i, shape: jax.random.normal(ks[i], shape, jnp.float32) * sc
  return {
      "conv1_w": n(0, (C1, IN_CH, K1, K1)),   # torch Conv2d (O, I, kh, kw)
      "conv1_b": n(1, (C1,)),
      "conv2_w": n(2, (C2, C1, K2, K2)),
      "conv2_b": n(3, (C2,)),
      "fc1_w":   n(4, (N_HID, N_FLAT)),       # torch Linear (out, in)
      "fc1_b":   n(5, (N_HID,)),
      "fc2_w":   n(6, (N_CLS, N_HID)),
      "fc2_b":   n(7, (N_CLS,)),
      "head1_w": n(8, (64, N_CLS)),
      "head1_b": n(9, (64,)),
      "head2_w": n(10, (2, 64)),
      "head2_b": n(11, (2,)),
  }


def prepare_params(tp, batch):
  """One-time re-layout: conv weights -> im2col layouts, fc1 CHW->(s,c) row
  permutation, 200->256 alignment padding, bf16 casts of the heavy operands."""
  bf16 = jnp.bfloat16
  gstack = jnp.asarray(_build_gather(batch)).astype(bf16)
  w1 = jnp.transpose(tp["conv1_w"], (2, 3, 1, 0)).reshape(K1_FEAT, C1)
  w1 = jnp.pad(w1, ((0, K1_PAD - K1_FEAT), (0, 0))).astype(bf16)
  w2 = jnp.transpose(tp["conv2_w"], (2, 3, 1, 0)).reshape(K2_FEAT, C2).astype(bf16)
  # fc1: torch (out, in) with in-index = c*9 + s  ->  rows ordered s*64 + c.
  wfc1 = tp["fc1_w"].T.reshape(C2, P2 * P2, N_HID).transpose(1, 0, 2)
  wfc1 = wfc1.reshape(N_FLAT, N_HID)
  wfc1 = jnp.pad(wfc1, ((0, 0), (0, N_HID_PAD - N_HID))).astype(bf16)
  bfc1 = jnp.pad(tp["fc1_b"], (0, N_HID_PAD - N_HID)).reshape(1, -1)
  wfc2 = jnp.pad(tp["fc2_w"].T, ((0, N_HID_PAD - N_HID), (0, 0))).astype(bf16)
  return {
      "g": gstack,
      "w1": w1, "b1": tp["conv1_b"].reshape(1, -1),
      "w2": w2, "b2": tp["conv2_b"].reshape(1, -1),
      "wfc1": wfc1, "bfc1": bfc1,
      "wfc2": wfc2, "bfc2": tp["fc2_b"].reshape(1, -1),
      "wh1": tp["head1_w"].T, "bh1": tp["head1_b"].reshape(1, -1),
      "wh2": tp["head2_w"].T, "bh2": tp["head2_b"].reshape(1, -1),
  }


@jax.jit
def baseline_forward(x, prep):
  """x: (B, 2, 14, 14) float32 -> (B, 2) softmax sorting predictions."""
  B = x.shape[0]
  patches = _conv1_patches(x)
  kern = functools.partial(_baseline_kernel, batch=B)

  flops = 2 * (4 * B * P1 * P1 * K1_PAD * C1            # conv1
               + (K2 * K2 * B * H2 * H2) * (B * P1 * P1) * C1   # conv2 gather
               + (B * H2 * H2) * K2_FEAT * C2            # conv2
               + B * N_FLAT * N_HID_PAD                  # fc1
               + B * N_HID_PAD * N_CLS                   # fc2
               + B * N_CLS * 64 + B * 64 * 2)            # head
  nbytes = (patches.size * patches.dtype.itemsize
            + sum(v.size * v.dtype.itemsize for v in jax.tree_util.tree_leaves(prep))
            + B * 2 * 4)

  return pl.pallas_call(
      kern,
      out_shape=jax.ShapeDtypeStruct((B, 2), jnp.float32),
      in_specs=[_VMEM] * 14,
      out_specs=_VMEM,
      scratch_shapes=[
          pltpu.VMEM((B * H2 * H2, K2_FEAT), jnp.bfloat16),   # conv2 im2col slab
          pltpu.VMEM((B, N_FLAT), jnp.bfloat16),              # flattened pool2
      ],
      cost_estimate=pl.CostEstimate(flops=flops, transcendentals=2 * B,
                                    bytes_accessed=nbytes),
  )(patches, prep["w1"], prep["b1"], prep["g"], prep["w2"], prep["b2"],
    prep["wfc1"], prep["bfc1"], prep["wfc2"], prep["bfc2"],
    prep["wh1"], prep["bh1"], prep["wh2"], prep["bh2"])


# ---------------------------------------------------------------------------
# Pure-JAX reference (same math, torch-layout params) for a correctness check.
# ---------------------------------------------------------------------------
def reference_forward(x, tp):
  y = jax.lax.conv_general_dilated(
      x, tp["conv1_w"], (1, 1), ((1, 1), (1, 1)),
      dimension_numbers=("NCHW", "OIHW", "NCHW"))
  y = jnp.maximum(y + tp["conv1_b"][None, :, None, None], 0.0)
  y = jax.lax.reduce_window(y, -jnp.inf, jax.lax.max,
                            (1, 1, 2, 2), (1, 1, 2, 2), "VALID")
  y = jax.lax.conv_general_dilated(
      y, tp["conv2_w"], (1, 1), ((1, 1), (1, 1)),
      dimension_numbers=("NCHW", "OIHW", "NCHW"))
  y = jnp.maximum(y + tp["conv2_b"][None, :, None, None], 0.0)
  y = jax.lax.reduce_window(y, -jnp.inf, jax.lax.max,
                            (1, 1, 2, 2), (1, 1, 2, 2), "VALID")
  flat = y.reshape(y.shape[0], -1)                      # NCHW flatten = CHW order
  h = jnp.maximum(flat @ tp["fc1_w"].T + tp["fc1_b"], 0.0)
  c = h @ tp["fc2_w"].T + tp["fc2_b"]
  c = jnp.maximum(c, 0.0)
  d = jnp.maximum(c @ tp["head1_w"].T + tp["head1_b"], 0.0)
  logits = d @ tp["head2_w"].T + tp["head2_b"]
  return jax.nn.softmax(logits, axis=1)


# ---------------------------------------------------------------------------
if __name__ == "__main__":
  key = jax.random.PRNGKey(0)
  k_x, k_p = jax.random.split(key)
  x = jax.random.normal(k_x, (2, IN_CH, H_IN, H_IN), jnp.float32)
  torch_params = init_params(k_p)
  prep = prepare_params(torch_params, batch=x.shape[0])

  out = baseline_forward(x, prep)
  jax.block_until_ready(out)

  assert out.shape == (2, 2)
  assert bool(jnp.all(jnp.isfinite(out)))
  # softmax rows sum to ~1 (exact divide in the epilogue)
  assert bool(jnp.allclose(jnp.sum(out, axis=1), 1.0, atol=1e-3))
  # matches the pure-JAX / torch-semantics reference (bf16 weights -> 2e-2)
  ref = reference_forward(x, torch_params)
  assert bool(jnp.allclose(out, ref, atol=2e-2)), (out, ref)

  print("KERNEL_OK")
</pallas_src>

<mosaic_0001>
module attributes {stable_mosaic.version = 11 : i64} {
  func.func @_baseline_kernel(%arg0: memref<288x64xbf16, #tpu.memory_space<vmem>>, %arg1: memref<64x32xbf16, #tpu.memory_space<vmem>>, %arg2: memref<1x32xf32, #tpu.memory_space<vmem>>, %arg3: memref<648x72xbf16, #tpu.memory_space<vmem>>, %arg4: memref<288x64xbf16, #tpu.memory_space<vmem>>, %arg5: memref<1x64xf32, #tpu.memory_space<vmem>>, %arg6: memref<576x256xbf16, #tpu.memory_space<vmem>>, %arg7: memref<1x256xf32, #tpu.memory_space<vmem>>, %arg8: memref<256x32xbf16, #tpu.memory_space<vmem>>, %arg9: memref<1x32xf32, #tpu.memory_space<vmem>>, %arg10: memref<32x64xf32, #tpu.memory_space<vmem>>, %arg11: memref<1x64xf32, #tpu.memory_space<vmem>>, %arg12: memref<64x2xf32, #tpu.memory_space<vmem>>, %arg13: memref<1x2xf32, #tpu.memory_space<vmem>>, %arg14: memref<2x2xf32, #tpu.memory_space<vmem>>, %arg15: memref<72x288xbf16, #tpu.memory_space<vmem>>, %arg16: memref<2x576xbf16, #tpu.memory_space<vmem>>) attributes {dimension_semantics = [], scalar_prefetch = 0 : i64, scratch_operands = 2 : i64, tpu.core_type = #tpu.core_type<tc>} {
    %c0 = arith.constant 0 : index
    %c0_0 = arith.constant 0 : index
    %0 = vector.load %arg0[%c0, %c0_0] : memref<288x64xbf16, #tpu.memory_space<vmem>>, vector<288x64xbf16>
    %c0_1 = arith.constant 0 : index
    %c0_2 = arith.constant 0 : index
    %1 = vector.load %arg1[%c0_1, %c0_2] : memref<64x32xbf16, #tpu.memory_space<vmem>>, vector<64x32xbf16>
    %cst = arith.constant dense<0.000000e+00> : vector<288x32xf32>
    %2 = tpu.matmul %0, %1, %cst {dimension_numbers = #tpu.dot_dimension_numbers<[1], [0], [0], [1], [0, 0, 1, 1], [], []>} : vector<288x64xbf16>, vector<64x32xbf16>, vector<288x32xf32> -> vector<288x32xf32>
    %c0_3 = arith.constant 0 : index
    %c0_4 = arith.constant 0 : index
    %3 = vector.load %arg2[%c0_3, %c0_4] : memref<1x32xf32, #tpu.memory_space<vmem>>, vector<1x32xf32>
    %4 = vector.broadcast %3 : vector<1x32xf32> to vector<288x32xf32>
    %5 = arith.addf %2, %4 : vector<288x32xf32>
    %cst_5 = arith.constant 0.000000e+00 : f32
    %6 = vector.broadcast %cst_5 : f32 to vector<288x32xf32>
    %7 = arith.maximumf %5, %6 : vector<288x32xf32>
    %8 = vector.extract_strided_slice %7 {offsets = [0, 0], sizes = [72, 32], strides = [1, 1]} : vector<288x32xf32> to vector<72x32xf32>
    %9 = vector.extract_strided_slice %7 {offsets = [72, 0], sizes = [72, 32], strides = [1, 1]} : vector<288x32xf32> to vector<72x32xf32>
    %10 = arith.maximumf %8, %9 : vector<72x32xf32>
    %11 = vector.extract_strided_slice %7 {offsets = [144, 0], sizes = [72, 32], strides = [1, 1]} : vector<288x32xf32> to vector<72x32xf32>
    %12 = vector.extract_strided_slice %7 {offsets = [216, 0], sizes = [72, 32], strides = [1, 1]} : vector<288x32xf32> to vector<72x32xf32>
    %13 = arith.maximumf %11, %12 : vector<72x32xf32>
    %14 = arith.maximumf %10, %13 : vector<72x32xf32>
    %c0_6 = arith.constant 0 : index
    %c0_7 = arith.constant 0 : index
    %15 = vector.load %arg3[%c0_6, %c0_7] : memref<648x72xbf16, #tpu.memory_space<vmem>>, vector<648x72xbf16>
    %16 = arith.truncf %14 : vector<72x32xf32> to vector<72x32xbf16>
    %cst_8 = arith.constant dense<0.000000e+00> : vector<648x32xf32>
    %17 = tpu.matmul %15, %16, %cst_8 {dimension_numbers = #tpu.dot_dimension_numbers<[1], [0], [0], [1], [0, 0, 1, 1], [], []>} : vector<648x72xbf16>, vector<72x32xbf16>, vector<648x32xf32> -> vector<648x32xf32>
    %18 = vector.extract_strided_slice %17 {offsets = [0, 0], sizes = [72, 32], strides = [1, 1]} : vector<648x32xf32> to vector<72x32xf32>
    %19 = arith.truncf %18 : vector<72x32xf32> to vector<72x32xbf16>
    %c0_9 = arith.constant 0 : index
    %c0_10 = arith.constant 0 : index
    %20 = vector.load %arg15[%c0_9, %c0_10] : memref<72x288xbf16, #tpu.memory_space<vmem>>, vector<72x32xbf16>
    tpu.vector_store %arg15[%c0_9, %c0_10], %19 {strides = array<i32>} : memref<72x288xbf16, #tpu.memory_space<vmem>>, vector<72x32xbf16>,
    %21 = vector.extract_strided_slice %17 {offsets = [72, 0], sizes = [72, 32], strides = [1, 1]} : vector<648x32xf32> to vector<72x32xf32>
    %22 = arith.truncf %21 : vector<72x32xf32> to vector<72x32xbf16>
    %c0_11 = arith.constant 0 : index
    %c32 = arith.constant 32 : index
    %23 = vector.load %arg15[%c0_11, %c32] : memref<72x288xbf16, #tpu.memory_space<vmem>>, vector<72x32xbf16>
    tpu.vector_store %arg15[%c0_11, %c32], %22 {strides = array<i32>} : memref<72x288xbf16, #tpu.memory_space<vmem>>, vector<72x32xbf16>,
    %24 = vector.extract_strided_slice %17 {offsets = [144, 0], sizes = [72, 32], strides = [1, 1]} : vector<648x32xf32> to vector<72x32xf32>
    %25 = arith.truncf %24 : vector<72x32xf32> to vector<72x32xbf16>
    %c0_12 = arith.constant 0 : index
    %c64 = arith.constant 64 : index
    %26 = vector.load %arg15[%c0_12, %c64] : memref<72x288xbf16, #tpu.memory_space<vmem>>, vector<72x32xbf16>
    tpu.vector_store %arg15[%c0_12, %c64], %25 {strides = array<i32>} : memref<72x288xbf16, #tpu.memory_space<vmem>>, vector<72x32xbf16>,
    %27 = vector.extract_strided_slice %17 {offsets = [216, 0], sizes = [72, 32], strides = [1, 1]} : vector<648x32xf32> to vector<72x32xf32>
    %28 = arith.truncf %27 : vector<72x32xf32> to vector<72x32xbf16>
    %c0_13 = arith.constant 0 : index
    %c96 = arith.constant 96 : index
    %29 = vector.load %arg15[%c0_13, %c96] : memref<72x288xbf16, #tpu.memory_space<vmem>>, vector<72x32xbf16>
    tpu.vector_store %arg15[%c0_13, %c96], %28 {strides = array<i32>} : memref<72x288xbf16, #tpu.memory_space<vmem>>, vector<72x32xbf16>,
    %30 = vector.extract_strided_slice %17 {offsets = [288, 0], sizes = [72, 32], strides = [1, 1]} : vector<648x32xf32> to vector<72x32xf32>
    %31 = arith.truncf %30 : vector<72x32xf32> to vector<72x32xbf16>
    %c0_14 = arith.constant 0 : index
    %c128 = arith.constant 128 : index
    %32 = vector.load %arg15[%c0_14, %c128] : memref<72x288xbf16, #tpu.memory_space<vmem>>, vector<72x32xbf16>
    tpu.vector_store %arg15[%c0_14, %c128], %31 {strides = array<i32>} : memref<72x288xbf16, #tpu.memory_space<vmem>>, vector<72x32xbf16>,
    %33 = vector.extract_strided_slice %17 {offsets = [360, 0], sizes = [72, 32], strides = [1, 1]} : vector<648x32xf32> to vector<72x32xf32>
    %34 = arith.truncf %33 : vector<72x32xf32> to vector<72x32xbf16>
    %c0_15 = arith.constant 0 : index
    %c160 = arith.constant 160 : index
    %35 = vector.load %arg15[%c0_15, %c160] : memref<72x288xbf16, #tpu.memory_space<vmem>>, vector<72x32xbf16>
    tpu.vector_store %arg15[%c0_15, %c160], %34 {strides = array<i32>} : memref<72x288xbf16, #tpu.memory_space<vmem>>, vector<72x32xbf16>,
    %36 = vector.extract_strided_slice %17 {offsets = [432, 0], sizes = [72, 32], strides = [1, 1]} : vector<648x32xf32> to vector<72x32xf32>
    %37 = arith.truncf %36 : vector<72x32xf32> to vector<72x32xbf16>
    %c0_16 = arith.constant 0 : index
    %c192 = arith.constant 192 : index
    %38 = vector.load %arg15[%c0_16, %c192] : memref<72x288xbf16, #tpu.memory_space<vmem>>, vector<72x32xbf16>
    tpu.vector_store %arg15[%c0_16, %c192], %37 {strides = array<i32>} : memref<72x288xbf16, #tpu.memory_space<vmem>>, vector<72x32xbf16>,
    %39 = vector.extract_strided_slice %17 {offsets = [504, 0], sizes = [72, 32], strides = [1, 1]} : vector<648x32xf32> to vector<72x32xf32>
    %40 = arith.truncf %39 : vector<72x32xf32> to vector<72x32xbf16>
    %c0_17 = arith.constant 0 : index
    %c224 = arith.constant 224 : index
    %41 = vector.load %arg15[%c0_17, %c224] : memref<72x288xbf16, #tpu.memory_space<vmem>>, vector<72x32xbf16>
    tpu.vector_store %arg15[%c0_17, %c224], %40 {strides = array<i32>} : memref<72x288xbf16, #tpu.memory_space<vmem>>, vector<72x32xbf16>,
    %42 = vector.extract_strided_slice %17 {offsets = [576, 0], sizes = [72, 32], strides = [1, 1]} : vector<648x32xf32> to vector<72x32xf32>
    %43 = arith.truncf %42 : vector<72x32xf32> to vector<72x32xbf16>
    %c0_18 = arith.constant 0 : index
    %c256 = arith.constant 256 : index
    %44 = vector.load %arg15[%c0_18, %c256] : memref<72x288xbf16, #tpu.memory_space<vmem>>, vector<72x32xbf16>
    tpu.vector_store %arg15[%c0_18, %c256], %43 {strides = array<i32>} : memref<72x288xbf16, #tpu.memory_space<vmem>>, vector<72x32xbf16>,
    %c0_19 = arith.constant 0 : index
    %c0_20 = arith.constant 0 : index
    %45 = vector.load %arg15[%c0_19, %c0_20] : memref<72x288xbf16, #tpu.memory_space<vmem>>, vector<72x288xbf16>
    %c0_21 = arith.constant 0 : index
    %c0_22 = arith.constant 0 : index
    %46 = vector.load %arg4[%c0_21, %c0_22] : memref<288x64xbf16, #tpu.memory_space<vmem>>, vector<288x64xbf16>
    %cst_23 = arith.constant dense<0.000000e+00> : vector<72x64xf32>
    %47 = tpu.matmul %45, %46, %cst_23 {dimension_numbers = #tpu.dot_dimension_numbers<[1], [0], [0], [1], [0, 0, 1, 1], [], []>} : vector<72x288xbf16>, vector<288x64xbf16>, vector<72x64xf32> -> vector<72x64xf32>
    %c0_24 = arith.constant 0 : index
    %c0_25 = arith.constant 0 : index
    %48 = vector.load %arg5[%c0_24, %c0_25] : memref<1x64xf32, #tpu.memory_space<vmem>>, vector<1x64xf32>
    %49 = vector.broadcast %48 : vector<1x64xf32> to vector<72x64xf32>
    %50 = arith.addf %47, %49 : vector<72x64xf32>
    %cst_26 = arith.constant 0.000000e+00 : f32
    %51 = vector.broadcast %cst_26 : f32 to vector<72x64xf32>
    %52 = arith.maximumf %50, %51 : vector<72x64xf32>
    %53 = vector.extract_strided_slice %52 {offsets = [0, 0], sizes = [18, 64], strides = [1, 1]} : vector<72x64xf32> to vector<18x64xf32>
    %54 = vector.extract_strided_slice %52 {offsets = [18, 0], sizes = [18, 64], strides = [1, 1]} : vector<72x64xf32> to vector<18x64xf32>
    %55 = arith.maximumf %53, %54 : vector<18x64xf32>
    %56 = vector.extract_strided_slice %52 {offsets = [36, 0], sizes = [18, 64], strides = [1, 1]} : vector<72x64xf32> to vector<18x64xf32>
    %57 = vector.extract_strided_slice %52 {offsets = [54, 0], sizes = [18, 64], strides = [1, 1]} : vector<72x64xf32> to vector<18x64xf32>
    %58 = arith.maximumf %56, %57 : vector<18x64xf32>
    %59 = arith.maximumf %55, %58 : vector<18x64xf32>
    %60 = vector.extract_strided_slice %59 {offsets = [0, 0], sizes = [2, 64], strides = [1, 1]} : vector<18x64xf32> to vector<2x64xf32>
    %61 = arith.truncf %60 : vector<2x64xf32> to vector<2x64xbf16>
    %c0_27 = arith.constant 0 : index
    %c0_28 = arith.constant 0 : index
    %62 = vector.load %arg16[%c0_27, %c0_28] : memref<2x576xbf16, #tpu.memory_space<vmem>>, vector<2x64xbf16>
    tpu.vector_store %arg16[%c0_27, %c0_28], %61 {strides = array<i32>} : memref<2x576xbf16, #tpu.memory_space<vmem>>, vector<2x64xbf16>,
    %63 = vector.extract_strided_slice %59 {offsets = [2, 0], sizes = [2, 64], strides = [1, 1]} : vector<18x64xf32> to vector<2x64xf32>
    %64 = arith.truncf %63 : vector<2x64xf32> to vector<2x64xbf16>
    %c0_29 = arith.constant 0 : index
    %c64_30 = arith.constant 64 : index
    %65 = vector.load %arg16[%c0_29, %c64_30] : memref<2x576xbf16, #tpu.memory_space<vmem>>, vector<2x64xbf16>
    tpu.vector_store %arg16[%c0_29, %c64_30], %64 {strides = array<i32>} : memref<2x576xbf16, #tpu.memory_space<vmem>>, vector<2x64xbf16>,
    %66 = vector.extract_strided_slice %59 {offsets = [4, 0], sizes = [2, 64], strides = [1, 1]} : vector<18x64xf32> to vector<2x64xf32>
    %67 = arith.truncf %66 : vector<2x64xf32> to vector<2x64xbf16>
    %c0_31 = arith.constant 0 : index
    %c128_32 = arith.constant 128 : index
    %68 = vector.load %arg16[%c0_31, %c128_32] : memref<2x576xbf16, #tpu.memory_space<vmem>>, vector<2x64xbf16>
    tpu.vector_store %arg16[%c0_31, %c128_32], %67 {strides = array<i32>} : memref<2x576xbf16, #tpu.memory_space<vmem>>, vector<2x64xbf16>,
    %69 = vector.extract_strided_slice %59 {offsets = [6, 0], sizes = [2, 64], strides = [1, 1]} : vector<18x64xf32> to vector<2x64xf32>
    %70 = arith.truncf %69 : vector<2x64xf32> to vector<2x64xbf16>
    %c0_33 = arith.constant 0 : index
    %c192_34 = arith.constant 192 : index
    %71 = vector.load %arg16[%c0_33, %c192_34] : memref<2x576xbf16, #tpu.memory_space<vmem>>, vector<2x64xbf16>
    tpu.vector_store %arg16[%c0_33, %c192_34], %70 {strides = array<i32>} : memref<2x576xbf16, #tpu.memory_space<vmem>>, vector<2x64xbf16>,
    %72 = vector.extract_strided_slice %59 {offsets = [8, 0], sizes = [2, 64], strides = [1, 1]} : vector<18x64xf32> to vector<2x64xf32>
    %73 = arith.truncf %72 : vector<2x64xf32> to vector<2x64xbf16>
    %c0_35 = arith.constant 0 : index
    %c256_36 = arith.constant 256 : index
    %74 = vector.load %arg16[%c0_35, %c256_36] : memref<2x576xbf16, #tpu.memory_space<vmem>>, vector<2x64xbf16>
    tpu.vector_store %arg16[%c0_35, %c256_36], %73 {strides = array<i32>} : memref<2x576xbf16, #tpu.memory_space<vmem>>, vector<2x64xbf16>,
    %75 = vector.extract_strided_slice %59 {offsets = [10, 0], sizes = [2, 64], strides = [1, 1]} : vector<18x64xf32> to vector<2x64xf32>
    %76 = arith.truncf %75 : vector<2x64xf32> to vector<2x64xbf16>
    %c0_37 = arith.constant 0 : index
    %c320 = arith.constant 320 : index
    %77 = vector.load %arg16[%c0_37, %c320] : memref<2x576xbf16, #tpu.memory_space<vmem>>, vector<2x64xbf16>
    tpu.vector_store %arg16[%c0_37, %c320], %76 {strides = array<i32>} : memref<2x576xbf16, #tpu.memory_space<vmem>>, vector<2x64xbf16>,
    %78 = vector.extract_strided_slice %59 {offsets = [12, 0], sizes = [2, 64], strides = [1, 1]} : vector<18x64xf32> to vector<2x64xf32>
    %79 = arith.truncf %78 : vector<2x64xf32> to vector<2x64xbf16>
    %c0_38 = arith.constant 0 : index
    %c384 = arith.constant 384 : index
    %80 = vector.load %arg16[%c0_38, %c384] : memref<2x576xbf16, #tpu.memory_space<vmem>>, vector<2x64xbf16>
    tpu.vector_store %arg16[%c0_38, %c384], %79 {strides = array<i32>} : memref<2x576xbf16, #tpu.memory_space<vmem>>, vector<2x64xbf16>,
    %81 = vector.extract_strided_slice %59 {offsets = [14, 0], sizes = [2, 64], strides = [1, 1]} : vector<18x64xf32> to vector<2x64xf32>
    %82 = arith.truncf %81 : vector<2x64xf32> to vector<2x64xbf16>
    %c0_39 = arith.constant 0 : index
    %c448 = arith.constant 448 : index
    %83 = vector.load %arg16[%c0_39, %c448] : memref<2x576xbf16, #tpu.memory_space<vmem>>, vector<2x64xbf16>
    tpu.vector_store %arg16[%c0_39, %c448], %82 {strides = array<i32>} : memref<2x576xbf16, #tpu.memory_space<vmem>>, vector<2x64xbf16>,
    %84 = vector.extract_strided_slice %59 {offsets = [16, 0], sizes = [2, 64], strides = [1, 1]} : vector<18x64xf32> to vector<2x64xf32>
    %85 = arith.truncf %84 : vector<2x64xf32> to vector<2x64xbf16>
    %c0_40 = arith.constant 0 : index
    %c512 = arith.constant 512 : index
    %86 = vector.load %arg16[%c0_40, %c512] : memref<2x576xbf16, #tpu.memory_space<vmem>>, vector<2x64xbf16>
    tpu.vector_store %arg16[%c0_40, %c512], %85 {strides = array<i32>} : memref<2x576xbf16, #tpu.memory_space<vmem>>, vector<2x64xbf16>,
    %c0_41 = arith.constant 0 : index
    %c0_42 = arith.constant 0 : index
    %87 = vector.load %arg16[%c0_41, %c0_42] : memref<2x576xbf16, #tpu.memory_space<vmem>>, vector<2x576xbf16>
    %c0_43 = arith.constant 0 : index
    %c0_44 = arith.constant 0 : index
    %88 = vector.load %arg6[%c0_43, %c0_44] : memref<576x256xbf16, #tpu.memory_space<vmem>>, vector<576x256xbf16>
    %cst_45 = arith.constant dense<0.000000e+00> : vector<2x256xf32>
    %89 = tpu.matmul %87, %88, %cst_45 {dimension_numbers = #tpu.dot_dimension_numbers<[1], [0], [0], [1], [0, 0, 1, 1], [], []>} : vector<2x576xbf16>, vector<576x256xbf16>, vector<2x256xf32> -> vector<2x256xf32>
    %c0_46 = arith.constant 0 : index
    %c0_47 = arith.constant 0 : index
    %90 = vector.load %arg7[%c0_46, %c0_47] : memref<1x256xf32, #tpu.memory_space<vmem>>, vector<1x256xf32>
    %91 = vector.broadcast %90 : vector<1x256xf32> to vector<2x256xf32>
    %92 = arith.addf %89, %91 : vector<2x256xf32>
    %cst_48 = arith.constant 0.000000e+00 : f32
    %93 = vector.broadcast %cst_48 : f32 to vector<2x256xf32>
    %94 = arith.maximumf %92, %93 : vector<2x256xf32>
    %95 = arith.truncf %94 : vector<2x256xf32> to vector<2x256xbf16>
    %c0_49 = arith.constant 0 : index
    %c0_50 = arith.constant 0 : index
    %96 = vector.load %arg8[%c0_49, %c0_50] : memref<256x32xbf16, #tpu.memory_space<vmem>>, vector<256x32xbf16>
    %cst_51 = arith.constant dense<0.000000e+00> : vector<2x32xf32>
    %97 = tpu.matmul %95, %96, %cst_51 {dimension_numbers = #tpu.dot_dimension_numbers<[1], [0], [0], [1], [0, 0, 1, 1], [], []>} : vector<2x256xbf16>, vector<256x32xbf16>, vector<2x32xf32> -> vector<2x32xf32>
    %c0_52 = arith.constant 0 : index
    %c0_53 = arith.constant 0 : index
    %98 = vector.load %arg9[%c0_52, %c0_53] : memref<1x32xf32, #tpu.memory_space<vmem>>, vector<1x32xf32>
    %99 = vector.broadcast %98 : vector<1x32xf32> to vector<2x32xf32>
    %100 = arith.addf %97, %99 : vector<2x32xf32>
    %cst_54 = arith.constant 0.000000e+00 : f32
    %101 = vector.broadcast %cst_54 : f32 to vector<2x32xf32>
    %102 = arith.maximumf %100, %101 : vector<2x32xf32>
    %c0_55 = arith.constant 0 : index
    %c0_56 = arith.constant 0 : index
    %103 = vector.load %arg10[%c0_55, %c0_56] : memref<32x64xf32, #tpu.memory_space<vmem>>, vector<32x64xf32>
    %cst_57 = arith.constant dense<0.000000e+00> : vector<2x64xf32>
    %104 = tpu.matmul %102, %103, %cst_57 {dimension_numbers = #tpu.dot_dimension_numbers<[1], [0], [0], [1], [0, 0, 1, 1], [], []>} : vector<2x32xf32>, vector<32x64xf32>, vector<2x64xf32> -> vector<2x64xf32>
    %c0_58 = arith.constant 0 : index
    %c0_59 = arith.constant 0 : index
    %105 = vector.load %arg11[%c0_58, %c0_59] : memref<1x64xf32, #tpu.memory_space<vmem>>, vector<1x64xf32>
    %106 = vector.broadcast %105 : vector<1x64xf32> to vector<2x64xf32>
    %107 = arith.addf %104, %106 : vector<2x64xf32>
    %cst_60 = arith.constant 0.000000e+00 : f32
    %108 = vector.broadcast %cst_60 : f32 to vector<2x64xf32>
    %109 = arith.maximumf %107, %108 : vector<2x64xf32>
    %c0_61 = arith.constant 0 : index
    %c0_62 = arith.constant 0 : index
    %110 = vector.load %arg12[%c0_61, %c0_62] : memref<64x2xf32, #tpu.memory_space<vmem>>, vector<64x2xf32>
    %cst_63 = arith.constant dense<0.000000e+00> : vector<2x2xf32>
    %111 = tpu.matmul %109, %110, %cst_63 {dimension_numbers = #tpu.dot_dimension_numbers<[1], [0], [0], [1], [0, 0, 1, 1], [], []>} : vector<2x64xf32>, vector<64x2xf32>, vector<2x2xf32> -> vector<2x2xf32>
    %c0_64 = arith.constant 0 : index
    %c0_65 = arith.constant 0 : index
    %112 = vector.load %arg13[%c0_64, %c0_65] : memref<1x2xf32, #tpu.memory_space<vmem>>, vector<1x2xf32>
    %113 = vector.broadcast %112 : vector<1x2xf32> to vector<2x2xf32>
    %114 = arith.addf %111, %113 : vector<2x2xf32>
    %cst_66 = arith.constant dense<0xFF800000> : vector<2xf32>
    %115 = vector.multi_reduction <maximumf>, %114, %cst_66 [1] : vector<2x2xf32> to vector<2xf32>
    %116 = vector.shape_cast %115 : vector<2xf32> to vector<2x1xf32>
    %117 = vector.broadcast %116 : vector<2x1xf32> to vector<2x2xf32>
    %118 = arith.subf %114, %117 : vector<2x2xf32>
    %119 = math.exp %118 : vector<2x2xf32>
    %cst_67 = arith.constant dense<0.000000e+00> : vector<2xf32>
    %120 = vector.multi_reduction <add>, %119, %cst_67 [1] : vector<2x2xf32> to vector<2xf32>
    %121 = vector.shape_cast %120 : vector<2xf32> to vector<2x1xf32>
    %122 = vector.broadcast %121 : vector<2x1xf32> to vector<2x2xf32>
    %123 = arith.divf %119, %122 : vector<2x2xf32>
    %c0_68 = arith.constant 0 : index
    %c0_69 = arith.constant 0 : index
    %124 = vector.load %arg14[%c0_68, %c0_69] : memref<2x2xf32, #tpu.memory_space<vmem>>, vector<2x2xf32>
    tpu.vector_store %arg14[%c0_68, %c0_69], %123 {strides = array<i32>} : memref<2x2xf32, #tpu.memory_space<vmem>>, vector<2x2xf32>,
    return
  }
}

</mosaic_0001>

<bundles_post_ra>
// kernel: baseline_forward.1
= control target key start
LH: loop header
LB: loop body
LE: loop exit
PB: predicated region body
PF: predicated region fallthrough
CT: control target
= control target key end

     0   :  { %s5085_s0 = inlined_call_operand.vmem [shape: bf16[288,64], index: 0, kind: input, shape index: {}]   ;;  %s5086_s1 = inlined_call_operand.vmem [shape: bf16[64,32], index: 1, kind: input, shape index: {}]   ;;  %s5087_s2 = inlined_call_operand.vmem [shape: f32[1,32], index: 2, kind: input, shape index: {}]   ;;  %s5088_s3 = inlined_call_operand.vmem [shape: bf16[648,72], index: 3, kind: input, shape index: {}]   ;;  %s5089_s4 = inlined_call_operand.vmem [shape: bf16[288,64], index: 4, kind: input, shape index: {}]   ;;  %s5090_s5 = inlined_call_operand.vmem [shape: f32[1,64], index: 5, kind: input, shape index: {}]   ;;  %s5091_s6 = inlined_call_operand.vmem [shape: bf16[576,256], index: 6, kind: input, shape index: {}]   ;;  %s5092_s7 = inlined_call_operand.vmem [shape: f32[1,256], index: 7, kind: input, shape index: {}]   ;;  %s5093_s8 = inlined_call_operand.vmem [shape: bf16[256,32], index: 8, kind: input, shape index: {}]   ;;  %s5094_s9 = inlined_call_operand.vmem [shape: f32[1,32], index: 9, kind: input, shape index: {}]   ;;  %s5095_s10 = inlined_call_operand.vmem [shape: f32[32,64], index: 10, kind: input, shape index: {}]   ;;  %s5096_s11 = inlined_call_operand.vmem [shape: f32[1,64], index: 11, kind: input, shape index: {}]   ;;  %s5097_s12 = inlined_call_operand.vmem [shape: f32[64,2], index: 12, kind: input, shape index: {}]   ;;  %s5098_s13 = inlined_call_operand.vmem [shape: f32[1,2], index: 13, kind: input, shape index: {}]   ;;  %s5099_s14 = inlined_call_operand.hbm [shape: f32[2,2], index: 14, kind: output, shape index: {}]  }
   0x1   :  { %v3558_v0 = vld [vmem:[%s5086_s1 + $0x18] sm:$0xff]  ;;  %v3557_v1 = vld [vmem:[%s5086_s1 + $0x10] sm:$0xff] }
   0x2   :  { %270 = vmatpush.bf16.msra.mxu0 %v3558_v0 }
   0x3   :  { %19 = vsyncpa [#allocation5], 0  ;;  %v3556_v2 = vld [vmem:[%s5086_s1 + $0x8] sm:$0xff]  ;;  %v3555_v3 = vld [vmem:[%s5086_s1] sm:$0xff]  ;;  %vm211_vm0 = vcmask 523264   ;;  %vm841_vm1 = vcmask 1043456  }
   0x4   :  { %v3537_v4 = vld [vmem:[%s5085_s0] sm:$0xff]  ;;  %v3538_v5 = vld [vmem:[%s5085_s0 + $0x8] sm:$0xff]  ;;  %v3539_v6 = vld [vmem:[%s5085_s0 + $0x10] sm:$0xff]  ;;  %vm717_vm2 = vcmask 588800   ;;  %vm1067_vm3 = vcmask 257024   ;;  %s3774_s25 = smov 32  }
   0x5   :  { %v3540_v7 = vld [vmem:[%s5085_s0 + $0x18] sm:$0xff]  ;;  %v3541_v8 = vld [vmem:[%s5085_s0 + $0x20] sm:$0xff]  ;;  %v3542_v9 = vld [vmem:[%s5085_s0 + $0x28] sm:$0xff]  ;;  %s3775_s18 = smov 64   ;;  %s3776_s21 = smov 96   ;;  %vm1122_vm4 = vcmask 519424  }
   0x6   :  { %271 = vmatpush.bf16.msra.mxu0 %v3557_v1  ;;  %v3543_v10 = vld [vmem:[%s5085_s0 + $0x30] sm:$0xff]  ;;  %v3544_v11 = vld [vmem:[%s5085_s0 + $0x38] sm:$0xff]  ;;  %v3545_v12 = vld [vmem:[%s5085_s0 + $0x40] sm:$0xff]  ;;  %vm1177_vm5 = vcmask 781824   ;;  %vm1232_vm6 = vcmask 1044224   ;;  %vm1676_vm7 = vcmask 261120  }
   0x7   :  { %v3546_v15 = vld [vmem:[%s5085_s0 + $0x48] sm:$0xff]  ;;  %v3547_v18 = vld [vmem:[%s5085_s0 + $0x50] sm:$0xff]  ;;  %v3548_v21 = vld [vmem:[%s5085_s0 + $0x58] sm:$0xff]  ;;  %vm1803_vm8 = vcmask 1045504   ;;  %vm1844_vm9 = vcmask 516096   ;;  %vm1854_vm10 = vcmask 1040896  }
   0x8   :  { %v3549_v24 = vld [vmem:[%s5085_s0 + $0x60] sm:$0xff]  ;;  %v3550_v34 = vld [vmem:[%s5085_s0 + $0x68] sm:$0xff]  ;;  %v3551_v47 = vld [vmem:[%s5085_s0 + $0x70] sm:$0xff]  ;;  %vm2707_vm11 = vcmask 9216  }
   0x9   :  { %v3925_v26 = vld [vmem:[%s5087_s2] ss:$0 sm:$0xff]  ;;  %v3552_v55 = vld [vmem:[%s5085_s0 + $0x78] sm:$0xff] }
   0xa   :  { %272 = vmatpush.bf16.msra.mxu0 %v3556_v2  ;;  %v3553_v63 = vld [vmem:[%s5085_s0 + $0x80] sm:$0xff] }
   0xe   :  { %273 = vmatpush.bf16.msra.mxu0 %v3555_v3 }
  0x11   :  { %2837 = vmatmul.msk.bf16.vlgmr.msra.gmra.mxu0 %vm211_vm0, %v3537_v4 }
  0x21   :  { %2838 = vmatmul.msk.bf16.gmra.mxu0 %vm211_vm0, %v3538_v5 }
  0x31   :  { %2839 = vmatmul.msk.bf16.gmra.mxu0 %vm211_vm0, %v3539_v6  ;;  %v3554_v6 = vld [vmem:[%s5085_s0 + $0x88] sm:$0xff] }
  0x41   :  { %2840 = vmatmul.msk.bf16.gmra.mxu0 %vm211_vm0, %v3540_v7 }
  0x51   :  { %2841 = vmatmul.msk.bf16.gmra.mxu0 %vm211_vm0, %v3541_v8 }
  0x61   :  { %2842 = vmatmul.msk.bf16.gmra.mxu0 %vm211_vm0, %v3542_v9 }
  0x71   :  { %2843 = vmatmul.msk.bf16.gmra.mxu0 %vm211_vm0, %v3543_v10 }
  0x81   :  { %2844 = vmatmul.msk.bf16.gmra.mxu0 %vm211_vm0, %v3544_v11 }
  0x8e   :  { %v275_v13 = vpop.f32.mrf.mxu0 }
  0x8f   :  { %v276_v27 = vadd.f32 %v3925_v26, %v275_v13 }
  0x91   :  { %2845 = vmatmul.msk.bf16.gmra.mxu0 %vm211_vm0, %v3545_v12  ;;  %v365_v30 = vmax.f32 %v276_v27, 0.0 }
  0x96   :  { %v277_v14 = vpop.f32.mrf.mxu0 }
  0x97   :  { %v278_v33 = vadd.f32 %v3925_v26, %v277_v14 }
  0x99   :  { %v366_v37 = vmax.f32 %v278_v33, 0.0 }
  0x9e   :  { %v280_v16 = vpop.f32.mrf.mxu0 }
  0x9f   :  { %v281_v40 = vadd.f32 %v3925_v26, %v280_v16 }
  0xa1   :  { %2846 = vmatmul.msk.bf16.gmra.mxu0 %vm211_vm0, %v3546_v15  ;;  %v367_v43 = vmax.f32 %v281_v40, 0.0 }
  0xa6   :  { %v282_v17 = vpop.f32.mrf.mxu0 }
  0xa7   :  { %v283_v46 = vadd.f32 %v3925_v26, %v282_v17 }
  0xa9   :  { %v368_v50 = vmax.f32 %v283_v46, 0.0 }
  0xae   :  { %v3908_v19 = vpop.f32.mrf.mxu0 }
  0xb1   :  { %2847 = vmatmul.msk.bf16.gmra.mxu0 %vm211_vm0, %v3547_v18 }
  0xb6   :  { %v287_v20 = vpop.f32.mrf.mxu0 }
  0xb7   :  { %v288_v54 = vadd.f32 %v3925_v26, %v287_v20 }
  0xb9   :  { %v370_v58 = vmax.f32 %v288_v54, 0.0 }
  0xbe   :  { %v3914_v22 = vpop.f32.mrf.mxu0 }
  0xc1   :  { %2848 = vmatmul.msk.bf16.gmra.mxu0 %vm211_vm0, %v3548_v21 }
  0xc6   :  { %v292_v23 = vpop.f32.mrf.mxu0 }
  0xc7   :  { %v293_v62 = vadd.f32 %v3925_v26, %v292_v23 }
  0xc9   :  { %v372_v2 = vmax.f32 %v293_v62, 0.0 }
  0xce   :  { %v3920_v25 = vpop.f32.mrf.mxu0 }
  0xd1   :  { %2849 = vmatmul.msk.bf16.gmra.mxu0 %vm211_vm0, %v3549_v24 }
  0xd6   :  { %v297_v28 = vpop.f32.mrf.mxu0 }
  0xd7   :  { %v298_v29 = vadd.f32 %v3925_v26, %v297_v28 }
  0xd9   :  { %v374_v31 = vmax.f32 %v298_v29, 0.0 }
  0xdb   :  { %v3930_v32 = vmax.f32 %v365_v30, %v374_v31 }
  0xde   :  { %v300_v35 = vpop.f32.mrf.mxu0 }
  0xdf   :  { %v301_v36 = vadd.f32 %v3925_v26, %v300_v35 }
  0xe1   :  { %v375_v38 = vmax.f32 %v301_v36, 0.0  ;;  %2850 = vmatmul.msk.bf16.gmra.mxu0 %vm211_vm0, %v3550_v34 }
  0xe3   :  { %v3938_v39 = vmax.f32 %v366_v37, %v375_v38 }
  0xe6   :  { %v302_v41 = vpop.f32.mrf.mxu0 }
  0xe7   :  { %v303_v42 = vadd.f32 %v3925_v26, %v302_v41 }
  0xe9   :  { %v376_v44 = vmax.f32 %v303_v42, 0.0 }
  0xeb   :  { %v3942_v45 = vmax.f32 %v367_v43, %v376_v44 }
  0xee   :  { %v305_v48 = vpop.f32.mrf.mxu0 }
  0xef   :  { %v306_v49 = vadd.f32 %v3925_v26, %v305_v48 }
  0xf1   :  { %v377_v51 = vmax.f32 %v306_v49, 0.0  ;;  %2851 = vmatmul.msk.bf16.gmra.mxu0 %vm211_vm0, %v3551_v47 }
  0xf3   :  { %v3950_v52 = vmax.f32 %v368_v50, %v377_v51  ;;  %v286_v50 = vadd.f32 %v3925_v26, %v3908_v19 }
  0xf6   :  { %v307_v53 = vpop.f32.mrf.mxu0 }
  0xf7   :  { %v308_v49 = vadd.f32 %v3925_v26, %v307_v53 }
  0xfe   :  { %v310_v56 = vpop.f32.mrf.mxu0 }
  0xff   :  { %v311_v57 = vadd.f32 %v3925_v26, %v310_v56  ;;  %v378_v56 = vmax.f32 %v308_v49, 0.0  ;;  %v3586_v49 = vld [vmem:[%s5088_s3 + $0xd8] sm:$0xff] }
 0x101   :  { %v379_v59 = vmax.f32 %v311_v57, 0.0  ;;  %2852 = vmatmul.msk.bf16.gmra.mxu0 %vm211_vm0, %v3552_v55 }
 0x103   :  { %v3958_v60 = vmax.f32 %v370_v58, %v379_v59  ;;  %v369_v58 = vmax.f32 %v286_v50, 0.0  ;;  %v3563_v50 = vld [vmem:[%s5088_s3 + $0x20] sm:$0xff] }
 0x106   :  { %v3960_v61 = vpop.f32.mrf.mxu0 }
 0x10e   :  { %v315_v0 = vpop.f32.mrf.mxu0 }
 0x10f   :  { %v316_v1 = vadd.f32 %v3925_v26, %v315_v0 }
 0x111   :  { %v381_v3 = vmax.f32 %v316_v1, 0.0  ;;  %2853 = vmatmul.msk.bf16.gmra.mxu0 %vm211_vm0, %v3553_v63  ;;  %v405_v63 = vmax.f32 %v369_v58, %v378_v56  ;;  %v3588_v56 = vld [vmem:[%s5088_s3 + $0xe8] sm:$0xff]  ;;  %v3566_v58 = vld [vmem:[%s5088_s3 + $0x38] sm:$0xff] }
 0x113   :  { %v3968_v4 = vmax.f32 %v372_v2, %v381_v3 }
 0x116   :  { %v3970_v5 = vpop.f32.mrf.mxu0 }
 0x11e   :  { %v320_v7 = vpop.f32.mrf.mxu0 }
 0x11f   :  { %v321_v16 = vadd.f32 %v3925_v26, %v320_v7 }
 0x121   :  { %2854 = vmatmul.msk.bf16.gmra.mxu0 %vm211_vm0, %v3554_v6  ;;  %v383_v20 = vmax.f32 %v321_v16, 0.0 }
 0x126   :  { %v322_v8 = vpop.f32.mrf.mxu0 }
 0x127   :  { %v323_v24 = vadd.f32 %v3925_v26, %v322_v8  ;;  %v291_v8 = vadd.f32 %v3925_v26, %v3914_v22 }
 0x129   :  { %v384_v30 = vmax.f32 %v323_v24, 0.0 }
 0x12e   :  { %v325_v9 = vpop.f32.mrf.mxu0 }
 0x12f   :  { %v326_v34 = vadd.f32 %v3925_v26, %v325_v9 }
 0x131   :  { %v385_v40 = vmax.f32 %v326_v34, 0.0 }
 0x136   :  { %v327_v10 = vpop.f32.mrf.mxu0 }
 0x13e   :  { %v330_v11 = vpop.f32.mrf.mxu0 }
 0x13f   :  { %v331_v51 = vadd.f32 %v3925_v26, %v330_v11 }
 0x141   :  { %v387_v59 = vmax.f32 %v331_v51, 0.0  ;;  %v3587_v51 = vld [vmem:[%s5088_s3 + $0xe0] sm:$0xff] }
 0x146   :  { %v332_v12 = vpop.f32.mrf.mxu0 }
 0x147   :  { %v333_v53 = vadd.f32 %v3925_v26, %v332_v12 }
 0x149   :  { %v388_v3 = vmax.f32 %v333_v53, 0.0 }
 0x14e   :  { %v335_v13 = vpop.f32.mrf.mxu0 }
 0x14f   :  { %v336_v9 = vadd.f32 %v3925_v26, %v335_v13 }
 0x156   :  { %v3976_v14 = vpop.f32.mrf.mxu0 }
 0x15e   :  { %v3978_v15 = vpop.f32.mrf.mxu0 }
 0x166   :  { %v342_v17 = vpop.f32.mrf.mxu0 }
 0x167   :  { %v343_v18 = vadd.f32 %v3925_v26, %v342_v17 }
 0x169   :  { %v392_v21 = vmax.f32 %v343_v18, 0.0  ;;  %v371_v18 = vmax.f32 %v291_v8, 0.0 }
 0x16b   :  { %v410_v23 = vmax.f32 %v383_v20, %v392_v21  ;;  %v389_v20 = vmax.f32 %v336_v9, 0.0 }
 0x16d   :  { %v419_v27 = vmax.f32 %v3930_v32, %v410_v23  ;;  %v328_v32 = vadd.f32 %v3925_v26, %v327_v10 }
 0x16e   :  { %v345_v28 = vpop.f32.mrf.mxu0 }
 0x16f   :  { %v346_v29 = vadd.f32 %v3925_v26, %v345_v28  ;;  %v386_v47 = vmax.f32 %v328_v32, 0.0 }
 0x171   :  { %v393_v31 = vmax.f32 %v346_v29, 0.0 }
 0x173   :  { %v411_v33 = vmax.f32 %v384_v30, %v393_v31  ;;  %v296_v31 = vadd.f32 %v3925_v26, %v3920_v25 }
 0x175   :  { %v420_v35 = vmax.f32 %v3938_v39, %v411_v33  ;;  %v341_v33 = vadd.f32 %v3925_v26, %v3978_v15  ;;  %v3560_v15 = vld [vmem:[%s5088_s3 + $0x8] sm:$0xff] }
 0x176   :  { %v347_v36 = vpop.f32.mrf.mxu0 }
 0x177   :  { %v348_v37 = vadd.f32 %v3925_v26, %v347_v36  ;;  %v3988_v38 = vpack.c.bf16 %v420_v35, %v419_v27 }
 0x179   :  { %v394_v41 = vmax.f32 %v348_v37, 0.0 }
 0x17b   :  { %v412_v42 = vmax.f32 %v385_v40, %v394_v41  ;;  %v373_v40 = vmax.f32 %v296_v31, 0.0  ;;  %v391_v41 = vmax.f32 %v341_v33, 0.0 }
 0x17d   :  { %v421_v43 = vmax.f32 %v3942_v45, %v412_v42 }
 0x17e   :  { %v350_v44 = vpop.f32.mrf.mxu0 }
 0x17f   :  { %v351_v46 = vadd.f32 %v3925_v26, %v350_v44 }
 0x181   :  { %v395_v48 = vmax.f32 %v351_v46, 0.0  ;;  %v3584_v46 = vld [vmem:[%s5088_s3 + $0xc8] sm:$0xff] }
 0x183   :  { %v413_v39 = vmax.f32 %v386_v47, %v395_v48  ;;  %v3585_v47 = vld [vmem:[%s5088_s3 + $0xd0] sm:$0xff]  ;;  %v3562_v48 = vld [vmem:[%s5088_s3 + $0x18] sm:$0xff] }
 0x185   :  { %v422_v54 = vmax.f32 %v3950_v52, %v413_v39  ;;  %v313_v52 = vadd.f32 %v3925_v26, %v3960_v61  ;;  %v338_v61 = vadd.f32 %v3925_v26, %v3976_v14  ;;  %v3593_v39 = vld [vmem:[%s5088_s3 + $0x110] sm:$0xff] }
 0x186   :  { %v352_v55 = vpop.f32.mrf.mxu0 }
 0x187   :  { %v353_v57 = vadd.f32 %v3925_v26, %v352_v55  ;;  %v510_v45 = vpack.c.bf16 %v422_v54, %v421_v43  ;;  %v380_v16 = vmax.f32 %v313_v52, 0.0  ;;  %v390_v13 = vmax.f32 %v338_v61, 0.0  ;;  %v3594_v54 = vld [vmem:[%s5088_s3 + $0x118] sm:$0xff]  ;;  %v3564_v55 = vld [vmem:[%s5088_s3 + $0x28] sm:$0xff] }
 0x188   :  { %v3568_v52 = vld [vmem:[%s5088_s3 + $0x48] sm:$0xff]  ;;  %v3570_v61 = vld [vmem:[%s5088_s3 + $0x58] sm:$0xff] }
 0x189   :  { %v396_v62 = vmax.f32 %v353_v57, 0.0  ;;  %v407_v23 = vmax.f32 %v371_v18, %v380_v16  ;;  %v3565_v57 = vld [vmem:[%s5088_s3 + $0x30] sm:$0xff] }
 0x18b   :  { %v414_v0 = vmax.f32 %v387_v59, %v396_v62  ;;  %v3590_v59 = vld [vmem:[%s5088_s3 + $0xf8] sm:$0xff]  ;;  %v3567_v62 = vld [vmem:[%s5088_s3 + $0x40] sm:$0xff] }
 0x18d   :  { %v423_v1 = vmax.f32 %v405_v63, %v414_v0  ;;  %v3591_v63 = vld [vmem:[%s5088_s3 + $0x100] sm:$0xff] }
 0x18e   :  { %v355_v2 = vpop.f32.mrf.mxu0 }
 0x18f   :  { %v356_v19 = vadd.f32 %v3925_v26, %v355_v2 }
 0x191   :  { %v397_v6 = vmax.f32 %v356_v19, 0.0 }
 0x193   :  { %v415_v7 = vmax.f32 %v388_v3, %v397_v6 }
 0x195   :  { %v424_v10 = vmax.f32 %v3958_v60, %v415_v7  ;;  %v318_v60 = vadd.f32 %v3925_v26, %v3970_v5 }
 0x196   :  { %v357_v11 = vpop.f32.mrf.mxu0 }
 0x197   :  { %v358_v12 = vadd.f32 %v3925_v26, %v357_v11  ;;  %v511_v17 = vpack.c.bf16 %v424_v10, %v423_v1  ;;  %v382_v14 = vmax.f32 %v318_v60, 0.0 }
 0x199   :  { %v398_v21 = vmax.f32 %v358_v12, 0.0  ;;  %v409_v32 = vmax.f32 %v373_v40, %v382_v14  ;;  %v3569_v12 = vld [vmem:[%s5088_s3 + $0x50] sm:$0xff] }
 0x19b   :  { %v416_v24 = vmax.f32 %v389_v20, %v398_v21 }
 0x19d   :  { %v425_v27 = vmax.f32 %v407_v23, %v416_v24 }
 0x19e   :  { %v360_v28 = vpop.f32.mrf.mxu0 }
 0x19f   :  { %v361_v22 = vadd.f32 %v3925_v26, %v360_v28 }
 0x1a1   :  { %v399_v29 = vmax.f32 %v361_v22, 0.0 }
 0x1a3   :  { %v417_v30 = vmax.f32 %v390_v13, %v399_v29  ;;  %v3592_v13 = vld [vmem:[%s5088_s3 + $0x108] sm:$0xff] }
 0x1a5   :  { %v426_v34 = vmax.f32 %v3968_v4, %v417_v30  ;;  %v3583_v4 = vld [vmem:[%s5088_s3 + $0xc0] sm:$0xff] }
 0x1a6   :  { %v362_v35 = vpop.f32.mrf.mxu0 }
 0x1a7   :  { %v363_v36 = vadd.f32 %v3925_v26, %v362_v35  ;;  %v512_v37 = vpack.c.bf16 %v426_v34, %v425_v27  ;;  %v3559_v26 = vld [vmem:[%s5088_s3] sm:$0xff] }
 0x1a8   :  { %v3571_v35 = vld [vmem:[%s5088_s3 + $0x60] sm:$0xff] }
 0x1a9   :  { %v400_v42 = vmax.f32 %v363_v36, 0.0 }
 0x1ab   :  { %v418_v43 = vmax.f32 %v391_v41, %v400_v42 }
 0x1ad   :  { %v427_v5 = vmax.f32 %v409_v32, %v418_v43 }
 0x1af   :  { %v513_v44 = vpack.c.bf16 %v427_v5, %v427_v5 }
 0x1b1   :  { %v843_v25 = vsel %vm841_vm1, %v513_v44, 0  ;;  %v3572_v44 = vld [vmem:[%s5088_s3 + $0x68] sm:$0xff] }
 0x1b2   :  { %848 = vmatpush.bf16.msra.mxu1 %v843_v25  ;;  %3717 = vmatpush.bf16.msra.mxu2 %v843_v25 }
 0x1b3   :  { %3718 = vmatpush.bf16.msra.mxu3 %v843_v25 }
 0x1b6   :  { %849 = vmatpush.bf16.msra.mxu1 %v512_v37  ;;  %3719 = vmatpush.bf16.msra.mxu2 %v512_v37 }
 0x1b7   :  { %3720 = vmatpush.bf16.msra.mxu3 %v512_v37 }
 0x1ba   :  { %850 = vmatpush.bf16.msra.mxu1 %v511_v17  ;;  %3721 = vmatpush.bf16.msra.mxu2 %v511_v17 }
 0x1bb   :  { %3722 = vmatpush.bf16.msra.mxu3 %v511_v17 }
 0x1be   :  { %851 = vmatpush.bf16.msra.mxu1 %v510_v45  ;;  %3723 = vmatpush.bf16.msra.mxu2 %v510_v45 }
 0x1bf   :  { %3724 = vmatpush.bf16.msra.mxu3 %v510_v45  ;;  %v3589_v45 = vld [vmem:[%s5088_s3 + $0xf0] sm:$0xff] }
 0x1c2   :  { %852 = vmatpush.bf16.msra.mxu1 %v3988_v38  ;;  %3725 = vmatpush.bf16.msra.mxu2 %v3988_v38 }
 0x1c3   :  { %3726 = vmatpush.bf16.msra.mxu3 %v3988_v38  ;;  %v3561_v38 = vld [vmem:[%s5088_s3 + $0x10] sm:$0xff] }
 0x1c5   :  { %3015 = vmatmul.msk.bf16.vlgmr.msra.gmra.mxu1 %vm717_vm2, %v3559_v26  ;;  %3039 = vmatmul.msk.bf16.vlgmr.msra.gmra.mxu2 %vm717_vm2, %v3583_v4 }
 0x1c6   :  { %3049 = vmatmul.msk.bf16.vlgmr.msra.gmra.mxu3 %vm717_vm2, %v3593_v39  ;;  %v3573_v39 = vld [vmem:[%s5088_s3 + $0x70] sm:$0xff] }
 0x1d5   :  { %3016 = vmatmul.msk.bf16.gmra.mxu1 %vm717_vm2, %v3560_v15  ;;  %3040 = vmatmul.msk.bf16.gmra.mxu2 %vm717_vm2, %v3584_v46 }
 0x1d6   :  { %3050 = vmatmul.msk.bf16.gmra.mxu3 %vm717_vm2, %v3594_v54 }
 0x1e5   :  { %3017 = vmatmul.msk.bf16.gmra.mxu1 %vm717_vm2, %v3561_v38  ;;  %3041 = vmatmul.msk.bf16.gmra.mxu2 %vm717_vm2, %v3585_v47 }
 0x1f5   :  { %3018 = vmatmul.msk.bf16.gmra.mxu1 %vm717_vm2, %v3562_v48  ;;  %3042 = vmatmul.msk.bf16.gmra.mxu2 %vm717_vm2, %v3586_v49 }
 0x205   :  { %3019 = vmatmul.msk.bf16.gmra.mxu1 %vm717_vm2, %v3563_v50  ;;  %3043 = vmatmul.msk.bf16.gmra.mxu2 %vm717_vm2, %v3587_v51 }
 0x215   :  { %3020 = vmatmul.msk.bf16.gmra.mxu1 %vm717_vm2, %v3564_v55  ;;  %3044 = vmatmul.msk.bf16.gmra.mxu2 %vm717_vm2, %v3588_v56 }
 0x225   :  { %3021 = vmatmul.msk.bf16.gmra.mxu1 %vm717_vm2, %v3565_v57  ;;  %3045 = vmatmul.msk.bf16.gmra.mxu2 %vm717_vm2, %v3589_v45  ;;  %v3574_v45 = vld [vmem:[%s5088_s3 + $0x78] sm:$0xff] }
 0x235   :  { %3022 = vmatmul.msk.bf16.gmra.mxu1 %vm717_vm2, %v3566_v58  ;;  %3046 = vmatmul.msk.bf16.gmra.mxu2 %vm717_vm2, %v3590_v59 }
 0x242   :  { %v854_v0 = vpop.f32.mrf.mxu1 }
 0x243   :  { %v1058_v53 = vpack.c.bf16 %v854_v0, %v854_v0 }
 0x245   :  { %1068 = vst.msk [vmem:[#allocation2] sm:$0xf] %vm1067_vm3, %v1058_v53  ;;  %3023 = vmatmul.msk.bf16.gmra.mxu1 %vm717_vm2, %v3567_v62  ;;  %3047 = vmatmul.msk.bf16.gmra.mxu2 %vm717_vm2, %v3591_v63 }
 0x248   :  { %v974_v1 = vpop.f32.mrf.mxu2 }
 0x249   :  { %v1263_v2 = vpack.c.bf16 %v974_v1, %v974_v1  ;;  %v4136_v31 = vpop.f32.mrf.mxu3  ;;  %v3575_v1 = vld [vmem:[%s5088_s3 + $0x80] sm:$0xff] }
 0x24a   :  { %v856_v19 = vpop.f32.mrf.mxu1 }
 0x24b   :  { %v1059_v3 = vpack.c.bf16 %v856_v19, %v856_v19  ;;  %1284 = vrot.lane.b32.xlu1 %v1263_v2, %s3774_s25 }
 0x24d   :  { %1069 = vst.msk [vmem:[#allocation2 + $0xc] sm:$0xf] %vm1067_vm3, %v1059_v3 }
 0x250   :  { %v4106_v6 = vpop.f32.mrf.mxu2 }
 0x251   :  { %v4143_v37 = vpop.f32.mrf.mxu3 }
 0x252   :  { %v859_v7 = vpop.f32.mrf.mxu1 }
 0x253   :  { %v1060_v8 = vpack.c.bf16 %v859_v7, %v859_v7 }
 0x255   :  { %1070 = vst.msk [vmem:[#allocation2 + $0x18] sm:$0xf] %vm1067_vm3, %v1060_v8  ;;  %3024 = vmatmul.msk.bf16.gmra.mxu1 %vm717_vm2, %v3568_v52  ;;  %3048 = vmatmul.msk.bf16.gmra.mxu2 %vm717_vm2, %v3592_v13  ;;  %v3576_v8 = vld [vmem:[%s5088_s3 + $0x88] sm:$0xff]  ;;  %v3578_v13 = vld [vmem:[%s5088_s3 + $0x98] sm:$0xff] }
 0x258   :  { %v4113_v9 = vpop.f32.mrf.mxu2 }
 0x259   :  { %v4147_v32 = vpop.f32.mrf.mxu3 }
 0x25a   :  { %v861_v10 = vpop.f32.mrf.mxu1 }
 0x25b   :  { %v1061_v11 = vpack.c.bf16 %v861_v10, %v861_v10 }
 0x25d   :  { %1071 = vst.msk [vmem:[#allocation2 + $0x24] sm:$0xf] %vm1067_vm3, %v1061_v11 }
 0x260   :  { %v4116_v16 = vpop.f32.mrf.mxu2 }
 0x261   :  { %v1031_v4 = vpop.f32.mrf.mxu3 }
 0x262   :  { %v864_v17 = vpop.f32.mrf.mxu1  ;;  %v1376_v15 = vpack.c.bf16 %v1031_v4, %v1031_v4 }
 0x263   :  { %v1062_v18 = vpack.c.bf16 %v864_v17, %v864_v17 }
 0x264   :  { %1402 = vrot.lane.b32.xlu2 %v1376_v15, %s3776_s21  ;;  %v3618_v15 = vld [vmem:[%s5089_s4 + $0x38] sm:$0xff] }
 0x265   :  { %1072 = vst.msk [vmem:[#allocation2 + $0x30] sm:$0xf] %vm1067_vm3, %v1062_v18  ;;  %3025 = vmatmul.msk.bf16.gmra.mxu1 %vm717_vm2, %v3569_v12  ;;  %v3577_v18 = vld [vmem:[%s5088_s3 + $0x90] sm:$0xff]  ;;  %1692 = vmatpush.bf16.msrb.mxu0 %v3618_v15 }
 0x266   :  { %3727 = vmatpush.bf16.msrb.mxu2 %v3618_v15 }
 0x268   :  { %v4123_v20 = vpop.f32.mrf.mxu2 }
 0x26a   :  { %v866_v21 = vpop.f32.mrf.mxu1 }
 0x26b   :  { %v1063_v23 = vpack.c.bf16 %v866_v21, %v866_v21 }
 0x26d   :  { %1073 = vst.msk [vmem:[#allocation2 + $0x3c] sm:$0xf] %vm1067_vm3, %v1063_v23 }
 0x270   :  { %v986_v24 = vpop.f32.mrf.mxu2 }
 0x271   :  { %v1268_v27 = vpack.c.bf16 %v986_v24, %v986_v24 }
 0x272   :  { %v869_v28 = vpop.f32.mrf.mxu1 }
 0x273   :  { %v1064_v22 = vpack.c.bf16 %v869_v28, %v869_v28  ;;  %1294 = vrot.lane.b32.xlu0 %v1268_v27, %s3774_s25 }
 0x275   :  { %1074 = vst.msk [vmem:[#allocation2 + $0x48] sm:$0xf] %vm1067_vm3, %v1064_v22  ;;  %3026 = vmatmul.msk.bf16.gmra.mxu1 %vm717_vm2, %v3570_v61  ;;  %v1264_v22 = vpack.c.bf16 %v4106_v6, %v4106_v6 }
 0x278   :  { %v989_v29 = vpop.f32.mrf.mxu2 }
 0x279   :  { %v1314_v38 = vpack.c.bf16 %v989_v29, %v989_v29 }
 0x27a   :  { %v871_v60 = vpop.f32.mrf.mxu1 }
 0x27b   :  { %v1065_v30 = vpack.c.bf16 %v871_v60, %v871_v60  ;;  %1332 = vrot.lane.b32.xlu2 %v1314_v38, %s3775_s18 }
 0x27d   :  { %1075 = vst.msk [vmem:[#allocation2 + $0x54] sm:$0xf] %vm1067_vm3, %v1065_v30 }
 0x280   :  { %v991_v33 = vpop.f32.mrf.mxu2 }
 0x281   :  { %v1315_v34 = vpack.c.bf16 %v991_v33, %v991_v33 }
 0x282   :  { %v874_v14 = vpop.f32.mrf.mxu1 }
 0x283   :  { %v1066_v36 = vpack.c.bf16 %v874_v14, %v874_v14  ;;  %1334 = vrot.lane.b32.xlu0 %v1315_v34, %s3775_s18  ;;  %v3579_v14 = vld [vmem:[%s5088_s3 + $0xa0] sm:$0xff] }
 0x285   :  { %1076 = vst.msk [vmem:[#allocation2 + $0x60] sm:$0xf] %vm1067_vm3, %v1066_v36  ;;  %3027 = vmatmul.msk.bf16.gmra.mxu1 %vm717_vm2, %v3571_v35 }
 0x288   :  { %v994_v40 = vpop.f32.mrf.mxu2 }
 0x289   :  { %v1316_v50 = vpack.c.bf16 %v994_v40, %v994_v40 }
 0x28a   :  { %v876_v41 = vpop.f32.mrf.mxu1 }
 0x28b   :  { %v1077_v42 = vpack.c.bf16 %v876_v41, %v876_v41  ;;  %1336 = vrot.lane.b32.xlu2 %v1316_v50, %s3775_s18  ;;  %v3581_v50 = vld [vmem:[%s5088_s3 + $0xb0] sm:$0xff] }
 0x28d   :  { %1095 = vrot.lane.b32.xlu0 %v1077_v42, %s3774_s25 }
 0x290   :  { %v996_v43 = vpop.f32.mrf.mxu2 }
 0x291   :  { %v1317_v5 = vpack.c.bf16 %v996_v43, %v996_v43 }
 0x292   :  { %v879_v25 = vpop.f32.mrf.mxu1 }
 0x293   :  { %v1078_v26 = vpack.c.bf16 %v879_v25, %v879_v25 }
 0x295   :  { %3028 = vmatmul.msk.bf16.gmra.mxu1 %vm717_vm2, %v3572_v44  ;;  %1338 = vrot.lane.b32.xlu0 %v1317_v5, %s3775_s18  ;;  %v3580_v44 = vld [vmem:[%s5088_s3 + $0xa8] sm:$0xff] }
 0x296   :  { %1097 = vrot.lane.b32.xlu1 %v1078_v26, %s3774_s25 }
 0x298   :  { %v4157_v46 = vpop.f32.mrf.mxu2 }
 0x29a   :  { %v881_v47 = vpop.f32.mrf.mxu1 }
 0x29b   :  { %v1079_v48 = vpack.c.bf16 %v881_v47, %v881_v47 }
 0x29d   :  { %1099 = vrot.lane.b32.xlu0 %v1079_v48, %s3774_s25 }
 0x2a0   :  { %v4161_v49 = vpop.f32.mrf.mxu2 }
 0x2a2   :  { %v884_v51 = vpop.f32.mrf.mxu1 }
 0x2a3   :  { %v1080_v54 = vpack.c.bf16 %v884_v51, %v884_v51 }
 0x2a5   :  { %3029 = vmatmul.msk.bf16.gmra.mxu1 %vm717_vm2, %v3573_v39  ;;  %1101 = vrot.lane.b32.xlu1 %v1080_v54, %s3774_s25 }
 0x2a8   :  { %v4169_v55 = vpop.f32.mrf.mxu2 }
 0x2aa   :  { %v4171_v56 = vpop.f32.mrf.mxu1 }
 0x2b0   :  { %v4173_v57 = vpop.f32.mrf.mxu2 }
 0x2b2   :  { %v4178_v58 = vpop.f32.mrf.mxu1 }
 0x2b5   :  { %3030 = vmatmul.msk.bf16.gmra.mxu1 %vm717_vm2, %v3574_v45 }
 0x2b8   :  { %v1009_v59 = vpop.f32.mrf.mxu2 }
 0x2b9   :  { %v1322_v62 = vpack.c.bf16 %v1009_v59, %v1009_v59 }
 0x2ba   :  { %v4181_v63 = vpop.f32.mrf.mxu1 }
 0x2bb   :  { %1348 = vrot.lane.b32.xlu1 %v1322_v62, %s3775_s18 }
 0x2bd   :  { %v4222_v35 = vpop.permute.xlu1 %1284 }
 0x2be   :  { %v4234_v41 = vpop.permute.xlu2 %1402 }
 0x2c0   :  { %v1011_v0 = vpop.f32.mrf.mxu2 }
 0x2c1   :  { %v1368_v53 = vpack.c.bf16 %v1011_v0, %v1011_v0 }
 0x2c2   :  { %v4187_v2 = vpop.f32.mrf.mxu1 }
 0x2c3   :  { %1386 = vrot.lane.b32.xlu1 %v1368_v53, %s3776_s21  ;;  %v3582_v53 = vld [vmem:[%s5088_s3 + $0xb8] sm:$0xff] }
 0x2c5   :  { %3031 = vmatmul.msk.bf16.gmra.mxu1 %vm717_vm2, %v3575_v1 }
 0x2c8   :  { %v1014_v19 = vpop.f32.mrf.mxu2 }
 0x2c9   :  { %v1369_v3 = vpack.c.bf16 %v1014_v19, %v1014_v19 }
 0x2ca   :  { %v896_v52 = vpop.f32.mrf.mxu1 }
 0x2cb   :  { %v1085_v7 = vpack.c.bf16 %v896_v52, %v896_v52  ;;  %1388 = vrot.lane.b32.xlu2 %v1369_v3, %s3776_s21  ;;  %v3617_v3 = vld [vmem:[%s5089_s4 + $0x30] sm:$0xff] }
 0x2cc   :  { %1693 = vmatpush.bf16.msrb.mxu0 %v3617_v3  ;;  %3728 = vmatpush.bf16.msrb.mxu2 %v3617_v3 }
 0x2cd   :  { %1111 = vrot.lane.b32.xlu0 %v1085_v7, %s3774_s25 }
 0x2d0   :  { %v1016_v27 = vpop.f32.mrf.mxu2 }
 0x2d1   :  { %v1370_v28 = vpack.c.bf16 %v1016_v27, %v1016_v27 }
 0x2d2   :  { %v899_v10 = vpop.f32.mrf.mxu1 }
 0x2d3   :  { %v1132_v11 = vpack.c.bf16 %v899_v10, %v899_v10  ;;  %1390 = vrot.lane.b32.xlu1 %v1370_v28, %s3776_s21 }
 0x2d5   :  { %3032 = vmatmul.msk.bf16.gmra.mxu1 %vm717_vm2, %v3576_v8  ;;  %1150 = vrot.lane.b32.xlu2 %v1132_v11, %s3775_s18  ;;  %v4243_v25 = vpop.permute.xlu2 %1332 }
 0x2d8   :  { %v1019_v33 = vpop.f32.mrf.mxu2 }
 0x2d9   :  { %v1371_v34 = vpack.c.bf16 %v1019_v33, %v1019_v33 }
 0x2da   :  { %v901_v12 = vpop.f32.mrf.mxu1 }
 0x2db   :  { %v1133_v17 = vpack.c.bf16 %v901_v12, %v901_v12 }
 0x2dd   :  { %1152 = vrot.lane.b32.xlu0 %v1133_v17, %s3775_s18  ;;  %1392 = vrot.lane.b32.xlu2 %v1371_v34, %s3776_s21 }
 0x2e2   :  { %v4202_v21 = vpop.f32.mrf.mxu1 }
 0x2e3   :  { %v1134_v27 = vpack.c.bf16 %v4202_v21, %v4202_v21  ;;  %v3614_v21 = vld [vmem:[%s5089_s4 + $0x18] sm:$0xff] }
 0x2e5   :  { %3033 = vmatmul.msk.bf16.gmra.mxu1 %vm717_vm2, %v3577_v18  ;;  %v4205_v61 = vpop.permute.xlu0 %1294  ;;  %v4251_v39 = vpop.permute.xlu2 %1336 }
 0x2ea   :  { %v906_v23 = vpop.f32.mrf.mxu1 }
 0x2eb   :  { %v1135_v24 = vpack.c.bf16 %v906_v23, %v906_v23  ;;  %v3616_v23 = vld [vmem:[%s5089_s4 + $0x28] sm:$0xff] }
 0x2ec   :  { %1694 = vmatpush.bf16.msrb.mxu0 %v3616_v23  ;;  %3729 = vmatpush.bf16.msrb.mxu2 %v3616_v23 }
 0x2ed   :  { %1156 = vrot.lane.b32.xlu0 %v1135_v24, %s3775_s18 }
 0x2f2   :  { %v4214_v29 = vpop.f32.mrf.mxu1 }
 0x2f5   :  { %3034 = vmatmul.msk.bf16.gmra.mxu1 %vm717_vm2, %v3578_v13  ;;  %v4217_v60 = vpop.permute.xlu0 %1334  ;;  %1286 = vrot.lane.b32.xlu0 %v1264_v22, %s3774_s25  ;;  %v3615_v22 = vld [vmem:[%s5089_s4 + $0x20] sm:$0xff] }
 0x2f6   :  { %1695 = vmatpush.bf16.msrb.mxu0 %v3615_v22  ;;  %3730 = vmatpush.bf16.msrb.mxu2 %v3615_v22 }
 0x2fa   :  { %v4220_v30 = vpop.f32.mrf.mxu1  ;;  %1696 = vmatpush.bf16.msrb.mxu0 %v3614_v21  ;;  %3731 = vmatpush.bf16.msrb.mxu2 %v3614_v21 }
 0x2ff   :  { %v1096_v6 = vpop.permute.xlu0 %1095 }
 0x300   :  { %1123 = vst.msk [vmem:[#allocation2] sm:$0xf] %vm1122_vm4, %v1096_v6 }
 0x302   :  { %v4229_v36 = vpop.f32.mrf.mxu1 }
 0x305   :  { %3035 = vmatmul.msk.bf16.gmra.mxu1 %vm717_vm2, %v3579_v14  ;;  %v3613_v14 = vld [vmem:[%s5089_s4 + $0x10] sm:$0xff] }
 0x306   :  { %1697 = vmatpush.bf16.msrb.mxu0 %v3613_v14  ;;  %3732 = vmatpush.bf16.msrb.mxu2 %v3613_v14  ;;  %v1319_v14 = vpack.c.bf16 %v4161_v49, %v4161_v49  ;;  %v1265_v49 = vpack.c.bf16 %v4113_v9, %v4113_v9 }
 0x307   :  { %v4232_v40 = vpop.permute.xlu0 %1338 }
 0x308   :  { %v1098_v42 = vpop.permute.xlu1 %1097 }
 0x309   :  { %1124 = vst.msk [vmem:[#allocation2 + $0xc] sm:$0xf] %vm1122_vm4, %v1098_v42  ;;  %v3595_v42 = vld [vmem:[%s5088_s3 + $0x120] sm:$0xff] }
 0x30a   :  { %v4237_v43 = vpop.f32.mrf.mxu1  ;;  %3051 = vmatmul.msk.bf16.gmra.mxu3 %vm717_vm2, %v3595_v42  ;;  %v508_v42 = vld [vmem:[%s5088_s3 + $0x140] sm:$0xf] }
 0x30f   :  { %v1100_v5 = vpop.permute.xlu0 %1099 }
 0x310   :  { %1125 = vst.msk [vmem:[#allocation2 + $0x18] sm:$0xf] %vm1122_vm4, %v1100_v5 }
 0x312   :  { %v919_v26 = vpop.f32.mrf.mxu1 }
 0x313   :  { %v1140_v4 = vpack.c.bf16 %v919_v26, %v919_v26  ;;  %v1318_v26 = vpack.c.bf16 %v4157_v46, %v4157_v46  ;;  %v1373_v46 = vpack.c.bf16 %v4136_v31, %v4136_v31 }
 0x315   :  { %3036 = vmatmul.msk.bf16.gmra.mxu1 %vm717_vm2, %v3580_v44  ;;  %1166 = vrot.lane.b32.xlu1 %v1140_v4, %s3775_s18  ;;  %v3612_v44 = vld [vmem:[%s5089_s4 + $0x8] sm:$0xff] }
 0x316   :  { %1698 = vmatpush.bf16.msrb.mxu0 %v3612_v44  ;;  %3733 = vmatpush.bf16.msrb.mxu2 %v3612_v44  ;;  %v675_v44 = vunpack.c.l.b16 %v508_v42 }
 0x317   :  { %v1102_v38 = vpop.permute.xlu1 %1101 }
 0x318   :  { %1126 = vst.msk [vmem:[#allocation2 + $0x24] sm:$0xf] %vm1122_vm4, %v1102_v38 }
 0x31a   :  { %v921_v47 = vpop.f32.mrf.mxu1 }
 0x31b   :  { %v1187_v48 = vpack.c.bf16 %v921_v47, %v921_v47  ;;  %v3611_v47 = vld [vmem:[%s5089_s4] sm:$0xff] }
 0x31c   :  { %1699 = vmatpush.bf16.msrb.mxu0 %v3611_v47  ;;  %3734 = vmatpush.bf16.msrb.mxu2 %v3611_v47 }
 0x31d   :  { %1205 = vrot.lane.b32.xlu1 %v1187_v48, %s3776_s21 }
 0x322   :  { %v924_v51 = vpop.f32.mrf.mxu1 }
 0x323   :  { %v1188_v54 = vpack.c.bf16 %v924_v51, %v924_v51 }
 0x325   :  { %3037 = vmatmul.msk.bf16.gmra.mxu1 %vm717_vm2, %v3581_v50  ;;  %1207 = vrot.lane.b32.xlu2 %v1188_v54, %s3776_s21  ;;  %v4259_v45 = vpop.permute.xlu2 %1388 }
 0x32a   :  { %v926_v59 = vpop.f32.mrf.mxu1 }
 0x32b   :  { %v1189_v62 = vpack.c.bf16 %v926_v59, %v926_v59  ;;  %v3596_v59 = vld [vmem:[%s5088_s3 + $0x128] sm:$0xff] }
 0x32c   :  { %3052 = vmatmul.msk.bf16.gmra.mxu3 %vm717_vm2, %v3596_v59 }
 0x32d   :  { %1209 = vrot.lane.b32.xlu1 %v1189_v62, %s3776_s21  ;;  %v4292_v13 = vpop.permute.xlu1 %1348  ;;  %v1136_v62 = vpack.c.bf16 %v4214_v29, %v4214_v29  ;;  %v3597_v29 = vld [vmem:[%s5088_s3 + $0x130] sm:$0xff] }
 0x32f   :  { %v1151_v0 = vpop.permute.xlu2 %1150 }
 0x330   :  { %1178 = vst.msk [vmem:[#allocation2] sm:$0xf] %vm1177_vm5, %v1151_v0 }
 0x332   :  { %v929_v1 = vpop.f32.mrf.mxu1 }
 0x333   :  { %v1190_v34 = vpack.c.bf16 %v929_v1, %v929_v1 }
 0x335   :  { %3038 = vmatmul.msk.bf16.gmra.mxu1 %vm717_vm2, %v3582_v53  ;;  %v4311_v15 = vpop.permute.xlu1 %1386 }
 0x337   :  { %v1393_v38 = vpop.permute.xlu2 %1392 }
 0x33a   :  { %v4267_v19 = vpop.f32.mrf.mxu1 }
 0x33c   :  { %3053 = vmatmul.msk.bf16.gmra.mxu3 %vm717_vm2, %v3597_v29  ;;  %v1321_v29 = vpack.c.bf16 %v4173_v57, %v4173_v57  ;;  %v1084_v57 = vpack.c.bf16 %v4187_v2, %v4187_v2  ;;  %v3628_v2 = vld [vmem:[%s5089_s4 + $0x88] sm:$0xff] }
 0x33d   :  { %1764 = vmatpush.bf16.msra.mxu2 %v3628_v2 }
 0x33f   :  { %v1112_v52 = vpop.permute.xlu0 %1111 }
 0x340   :  { %1131 = vst.msk [vmem:[#allocation2 + $0x60] sm:$0xf] %vm1122_vm4, %v1112_v52 }
 0x342   :  { %v4273_v7 = vpop.f32.mrf.mxu1 }
 0x343   :  { %v1192_v1 = vpack.c.bf16 %v4273_v7, %v4273_v7 }
 0x345   :  { %v4322_v51 = vpop.permute.xlu1 %1390 }
 0x34a   :  { %v4275_v8 = vpop.f32.mrf.mxu1 }
 0x34f   :  { %v1153_v10 = vpop.permute.xlu0 %1152 }
 0x350   :  { %1179 = vst.msk [vmem:[#allocation2 + $0xc] sm:$0xf] %vm1177_vm5, %v1153_v10 }
 0x352   :  { %v4278_v11 = vpop.f32.mrf.mxu1 }
 0x35a   :  { %v941_v12 = vpop.f32.mrf.mxu1 }
 0x35b   :  { %v1195_v17 = vpack.c.bf16 %v941_v12, %v941_v12  ;;  %v1320_v12 = vpack.c.bf16 %v4169_v55, %v4169_v55  ;;  %v3598_v55 = vld [vmem:[%s5088_s3 + $0x138] sm:$0xff] }
 0x35c   :  { %3054 = vmatmul.msk.bf16.gmra.mxu3 %vm717_vm2, %v3598_v55  ;;  %v3620_v55 = vld [vmem:[%s5089_s4 + $0x48] sm:$0xff] }
 0x35d   :  { %1221 = vrot.lane.b32.xlu2 %v1195_v17, %s3776_s21 }
 0x35f   :  { %v1157_v18 = vpop.permute.xlu0 %1156 }
 0x360   :  { %1181 = vst.msk [vmem:[#allocation2 + $0x24] sm:$0xf] %vm1177_vm5, %v1157_v18 }
 0x362   :  { %v944_v24 = vpop.f32.mrf.mxu1 }
 0x363   :  { %v1242_v28 = vpack.c.bf16 %v944_v24, %v944_v24 }
 0x365   :  { %1251 = vst.msk [vmem:[#allocation2 + $0x4] sm:$0xf] %vm1067_vm3, %v1242_v28  ;;  %1154 = vrot.lane.b32.xlu2 %v1134_v27, %s3775_s18  ;;  %v1375_v27 = vpack.c.bf16 %v4147_v32, %v4147_v32 }
 0x36a   :  { %v946_v33 = vpop.f32.mrf.mxu1 }
 0x36b   :  { %v1243_v6 = vpack.c.bf16 %v946_v33, %v946_v33  ;;  %v1138_v33 = vpack.c.bf16 %v4229_v36, %v4229_v36 }
 0x36d   :  { %1252 = vst.msk [vmem:[#allocation2 + $0x10] sm:$0xf] %vm1067_vm3, %v1243_v6  ;;  %1211 = vrot.lane.b32.xlu2 %v1190_v34, %s3776_s21  ;;  %v1194_v34 = vpack.c.bf16 %v4278_v11, %v4278_v11 }
 0x372   :  { %v949_v5 = vpop.f32.mrf.mxu1 }
 0x373   :  { %v1244_v4 = vpack.c.bf16 %v949_v5, %v949_v5 }
 0x375   :  { %1253 = vst.msk [vmem:[#allocation2 + $0x1c] sm:$0xf] %vm1067_vm3, %v1244_v4  ;;  %1340 = vrot.lane.b32.xlu2 %v1318_v26, %s3775_s18  ;;  %v716_v26 = vpack.c.b16 %v675_v44, %v675_v44 }
 0x377   :  { %3055 = vmatmul.msk.bf16.gmra.mxu3 %vm717_vm2, %v716_v26 }
 0x37a   :  { %v951_v48 = vpop.f32.mrf.mxu1 }
 0x37b   :  { %v1245_v50 = vpack.c.bf16 %v951_v48, %v951_v48  ;;  %v1021_v48 = vpop.f32.mrf.mxu2 }
 0x37d   :  { %1254 = vst.msk [vmem:[#allocation2 + $0x28] sm:$0xf] %vm1067_vm3, %v1245_v50  ;;  %1396 = vrot.lane.b32.xlu2 %v1373_v46, %s3776_s21  ;;  %v1081_v50 = vpack.c.bf16 %v4171_v56, %v4171_v56  ;;  %v1137_v56 = vpack.c.bf16 %v4220_v30, %v4220_v30  ;;  %v3624_v30 = vld [vmem:[%s5089_s4 + $0x68] sm:$0xff] }
 0x37e   :  { %1308 = vst.msk [vmem:[#allocation2 + $0x28] sm:$0xf] %vm1122_vm4, %v4222_v35  ;;  %v1287_v35 = vpop.permute.xlu0 %1286 }
 0x37f   :  { %1362 = vst.msk [vmem:[#allocation2 + $0x28] sm:$0xf] %vm1177_vm5, %v4232_v40  ;;  %v1208_v54 = vpop.permute.xlu2 %1207 }
 0x380   :  { %1416 = vst.msk [vmem:[#allocation2 + $0x28] sm:$0xf] %vm1232_vm6, %v1393_v38 }
 0x381   :  { %1234 = vst.msk [vmem:[#allocation2 + $0xc] sm:$0xf] %vm1232_vm6, %v1208_v54  ;;  %v1372_v54 = vpack.c.bf16 %v1021_v48, %v1021_v48 }
 0x382   :  { %v954_v31 = vpop.f32.mrf.mxu1 }
 0x383   :  { %v1246_v0 = vpack.c.bf16 %v954_v31, %v954_v31  ;;  %v3625_v31 = vld [vmem:[%s5089_s4 + $0x70] sm:$0xff] }
 0x385   :  { %1255 = vst.msk [vmem:[#allocation2 + $0x34] sm:$0xf] %vm1067_vm3, %v1246_v0  ;;  %1158 = vrot.lane.b32.xlu2 %v1136_v62, %s3775_s18  ;;  %v1082_v62 = vpack.c.bf16 %v4178_v58, %v4178_v58  ;;  %v1191_v58 = vpack.c.bf16 %v4267_v19, %v4267_v19  ;;  %v1374_v19 = vpack.c.bf16 %v4143_v37, %v4143_v37 }
 0x386   :  { %1309 = vst.msk [vmem:[#allocation2 + $0x34] sm:$0xf] %vm1122_vm4, %v1287_v35  ;;  %v1193_v37 = vpack.c.bf16 %v4275_v8, %v4275_v8  ;;  %v3627_v8 = vld [vmem:[%s5089_s4 + $0x80] sm:$0xff] }
 0x387   :  { %v1167_v40 = vpop.permute.xlu1 %1166  ;;  %1765 = vmatpush.bf16.msra.mxu2 %v3627_v8 }
 0x388   :  { %1186 = vst.msk [vmem:[#allocation2 + $0x60] sm:$0xf] %vm1177_vm5, %v1167_v40  ;;  %v3600_v18 = vld [vmem:[#allocation2 + $0x8] sm:$0xf0] }
 0x38a   :  { %v956_v53 = vpop.f32.mrf.mxu1 }
 0x38b   :  { %v1247_v3 = vpack.c.bf16 %v956_v53, %v956_v53 }
 0x38d   :  { %1256 = vst.msk [vmem:[#allocation2 + $0x40] sm:$0xf] %vm1067_vm3, %v1247_v3  ;;  %1215 = vrot.lane.b32.xlu2 %v1192_v1, %s3776_s21  ;;  %v1266_v1 = vpack.c.bf16 %v4116_v16, %v4116_v16  ;;  %v1267_v3 = vpack.c.bf16 %v4123_v20, %v4123_v20  ;;  %v3623_v16 = vld [vmem:[%s5089_s4 + $0x60] sm:$0xff]  ;;  %v3622_v20 = vld [vmem:[%s5089_s4 + $0x58] sm:$0xff] }
 0x38f   :  { %v1206_v52 = vpop.permute.xlu1 %1205 }
 0x390   :  { %1233 = vst.msk [vmem:[#allocation2] sm:$0xf] %vm1232_vm6, %v1206_v52  ;;  %v1083_v52 = vpack.c.bf16 %v4181_v63, %v4181_v63  ;;  %v1034_v63 = vpop.f32.mrf.mxu3 }
 0x392   :  { %v959_v10 = vpop.f32.mrf.mxu1 }
 0x393   :  { %v1248_v17 = vpack.c.bf16 %v959_v10, %v959_v10  ;;  %v1139_v10 = vpack.c.bf16 %v4237_v43, %v4237_v43  ;;  %v3621_v43 = vld [vmem:[%s5089_s4 + $0x50] sm:$0xff] }
 0x395   :  { %1257 = vst.msk [vmem:[#allocation2 + $0x4c] sm:$0xf] %vm1067_vm3, %v1248_v17  ;;  %1344 = vrot.lane.b32.xlu2 %v1320_v12, %s3775_s18  ;;  %v1422_v12 = vpack.c.bf16 %v1034_v63, %v1034_v63 }
 0x397   :  { %v3058_v7 = vld [vmem:[#allocation2] sm:$0xf]  ;;  %1431 = vst.msk [vmem:[#allocation2 + $0x8] sm:$0xf] %vm1067_vm3, %v1422_v12 }
 0x398   :  { %v3059_v23 = vor.u32 %v3600_v18, %v3058_v7  ;;  %v1036_v17 = vpop.f32.mrf.mxu3 }
 0x399   :  { %v1423_v7 = vpack.c.bf16 %v1036_v17, %v1036_v17 }
 0x39a   :  { %v961_v24 = vpop.f32.mrf.mxu1  ;;  %1700 = vmatmul.bf16.vlgmr.msrb.gmra.mxu0 %v3059_v23 }
 0x39b   :  { %v1249_v28 = vpack.c.bf16 %v961_v24, %v961_v24  ;;  %1432 = vst.msk [vmem:[#allocation2 + $0x14] sm:$0xf] %vm1067_vm3, %v1423_v7 }
 0x39d   :  { %1258 = vst.msk [vmem:[#allocation2 + $0x58] sm:$0xf] %vm1067_vm3, %v1249_v28  ;;  %1400 = vrot.lane.b32.xlu2 %v1375_v27, %s3776_s21 }
 0x39e   :  { %v3066_v24 = vld [vmem:[#allocation2 + $0x8] sm:$0xf] }
 0x39f   :  { %v1210_v47 = vpop.permute.xlu1 %1209 }
 0x3a2   :  { %v964_v22 = vpop.f32.mrf.mxu1  ;;  %v3601_v27 = vld [vmem:[#allocation2 + $0x10] sm:$0xf0] }
 0x3a3   :  { %v1250_v21 = vpack.c.bf16 %v964_v22, %v964_v22  ;;  %v3067_v28 = vor.u32 %v3601_v27, %v3066_v24 }
 0x3a5   :  { %1259 = vst.msk [vmem:[#allocation2 + $0x64] sm:$0xf] %vm1067_vm3, %v1250_v21  ;;  %1162 = vrot.lane.b32.xlu2 %v1138_v33, %s3775_s18  ;;  %v3619_v21 = vld [vmem:[%s5089_s4 + $0x40] sm:$0xff] }
 0x3a6   :  { %1313 = vst.msk [vmem:[#allocation2 + $0x64] sm:$0xf] %vm1122_vm4, %v4205_v61 }
 0x3a7   :  { %1367 = vst.msk [vmem:[#allocation2 + $0x64] sm:$0xf] %vm1177_vm5, %v4292_v13 }
 0x3a8   :  { %1421 = vst.msk [vmem:[#allocation2 + $0x64] sm:$0xf] %vm1232_vm6, %v4234_v41  ;;  %v3626_v41 = vld [vmem:[%s5089_s4 + $0x78] sm:$0xff] }
 0x3a9   :  { %1725 = vmatpush.bf16.msrb.mxu3 %v3626_v41 }
 0x3aa   :  { %v966_v32 = vpop.f32.mrf.mxu1 }
 0x3ab   :  { %v1260_v6 = vpack.c.bf16 %v966_v32, %v966_v32 }
 0x3ad   :  { %1219 = vrot.lane.b32.xlu2 %v1194_v34, %s3776_s21  ;;  %1278 = vrot.lane.b32.xlu0 %v1260_v6, %s3774_s25 }
 0x3ae   :  { %1726 = vmatpush.bf16.msrb.mxu3 %v3625_v31 }
 0x3af   :  { %v1039_v18 = vpop.f32.mrf.mxu3 }
 0x3b0   :  { %v1424_v23 = vpack.c.bf16 %v1039_v18, %v1039_v18 }
 0x3b2   :  { %v969_v36 = vpop.f32.mrf.mxu1  ;;  %1727 = vmatpush.bf16.msrb.mxu3 %v3624_v30  ;;  %1433 = vst.msk [vmem:[#allocation2 + $0x20] sm:$0xf] %vm1067_vm3, %v1424_v23 }
 0x3b3   :  { %v1261_v61 = vpack.c.bf16 %v969_v36, %v969_v36 }
 0x3b5   :  { %1342 = vrot.lane.b32.xlu0 %v1319_v14, %s3775_s18  ;;  %1280 = vrot.lane.b32.xlu1 %v1261_v61, %s3774_s25 }
 0x3b6   :  { %1728 = vmatpush.bf16.msrb.mxu3 %v3623_v16 }
 0x3b7   :  { %v1222_v13 = vpop.permute.xlu2 %1221  ;;  %v1041_v22 = vpop.f32.mrf.mxu3 }
 0x3b8   :  { %1241 = vst.msk [vmem:[#allocation2 + $0x60] sm:$0xf] %vm1232_vm6, %v1222_v13  ;;  %v1425_v33 = vpack.c.bf16 %v1041_v22, %v1041_v22 }
 0x3b9   :  { %v3078_v6 = vld [vmem:[#allocation2 + $0x20] sm:$0xf] }
 0x3ba   :  { %v971_v11 = vpop.f32.mrf.mxu1  ;;  %1729 = vmatpush.bf16.msrb.mxu3 %v3622_v20  ;;  %1434 = vst.msk [vmem:[#allocation2 + $0x2c] sm:$0xf] %vm1067_vm3, %v1425_v33 }
 0x3bb   :  { %v1262_v5 = vpack.c.bf16 %v971_v11, %v971_v11 }
 0x3bd   :  { %1288 = vrot.lane.b32.xlu1 %v1265_v49, %s3774_s25  ;;  %1282 = vrot.lane.b32.xlu0 %v1262_v5, %s3774_s25 }
 0x3be   :  { %1730 = vmatpush.bf16.msrb.mxu3 %v3621_v43 }
 0x3bf   :  { %v1155_v4 = vpop.permute.xlu2 %1154  ;;  %v4390_v38 = vld [vmem:[#allocation2 + $0x60] sm:$0xff]  ;;  %v1044_v32 = vpop.f32.mrf.mxu3 }
 0x3c0   :  { %1180 = vst.msk [vmem:[#allocation2 + $0x18] sm:$0xf] %vm1177_vm5, %v1155_v4  ;;  %v1540_v46 = vunpack.c.l.b16 %v4390_v38  ;;  %v1426_v34 = vpack.c.bf16 %v1044_v32, %v1044_v32 }
 0x3c1   :  { %1235 = vst.msk [vmem:[#allocation2 + $0x18] sm:$0xf] %vm1232_vm6, %v1210_v47  ;;  %v3604_v36 = vld [vmem:[#allocation2 + $0x28] sm:$0xf0] }
 0x3c2   :  { %v1555_v9 = vpack.c.b16 %v1540_v46, %v1540_v46  ;;  %1731 = vmatpush.bf16.msrb.mxu3 %v3620_v55  ;;  %1435 = vst.msk [vmem:[#allocation2 + $0x38] sm:$0xf] %vm1067_vm3, %v1426_v34  ;;  %v3079_v14 = vor.u32 %v3604_v36, %v3078_v6  ;;  %v1541_v6 = vunpack.c.h.b16 %v4390_v38 }
 0x3c4   :  { %1720 = vmatmul.bf16.vlgmr.msrb.gmra.mxu2 %v1555_v9 }
 0x3c5   :  { %1394 = vrot.lane.b32.xlu1 %v1372_v54, %s3776_s21  ;;  %1103 = vrot.lane.b32.xlu0 %v1081_v50, %s3774_s25 }
 0x3c6   :  { %1732 = vmatpush.bf16.msrb.mxu3 %v3619_v21 }
 0x3c7   :  { %v1212_v59 = vpop.permute.xlu2 %1211  ;;  %v1046_v61 = vpop.f32.mrf.mxu3 }
 0x3c8   :  { %1236 = vst.msk [vmem:[#allocation2 + $0x24] sm:$0xf] %vm1232_vm6, %v1212_v59  ;;  %v3070_v35 = vld [vmem:[#allocation2 + $0x18] sm:$0xf]  ;;  %v1427_v41 = vpack.c.bf16 %v1046_v61, %v1046_v61 }
 0x3c9   :  { %v3090_v26 = vld [vmem:[#allocation2 + $0x38] sm:$0xf] }
 0x3ca   :  { %1436 = vst.msk [vmem:[#allocation2 + $0x44] sm:$0xf] %vm1067_vm3, %v1427_v41 }
 0x3cd   :  { %1105 = vrot.lane.b32.xlu1 %v1082_v62, %s3774_s25  ;;  %1160 = vrot.lane.b32.xlu0 %v1137_v56, %s3775_s18 }
 0x3cf   :  { %v1341_v0 = vpop.permute.xlu2 %1340  ;;  %v3603_v40 = vld [vmem:[#allocation2 + $0x20] sm:$0xf0] }
 0x3d0   :  { %1363 = vst.msk [vmem:[#allocation2 + $0x34] sm:$0xf] %vm1177_vm5, %v1341_v0  ;;  %v3071_v53 = vor.u32 %v3603_v40, %v3070_v35 }
 0x3d2   :  { %1705 = vmatmul.bf16.gmra.mxu0 %v3071_v53 }
 0x3d4   :  { %3176 = vmatmul.msk.bf16.vlgmr.msra.gmra.mxu2 %vm1676_vm7, %v3067_v28 }
 0x3d5   :  { %1213 = vrot.lane.b32.xlu1 %v1191_v58, %s3776_s21  ;;  %1290 = vrot.lane.b32.xlu0 %v1266_v1, %s3774_s25 }
 0x3d7   :  { %v1397_v11 = vpop.permute.xlu2 %1396 }
 0x3dd   :  { %1292 = vrot.lane.b32.xlu1 %v1267_v3, %s3774_s25  ;;  %1346 = vrot.lane.b32.xlu0 %v1321_v29, %s3775_s18 }
 0x3df   :  { %v1049_v42 = vpop.f32.mrf.mxu3  ;;  %v1159_v4 = vpop.permute.xlu2 %1158 }
 0x3e0   :  { %v1428_v44 = vpack.c.bf16 %v1049_v42, %v1049_v42 }
 0x3e2   :  { %1437 = vst.msk [vmem:[#allocation2 + $0x50] sm:$0xf] %vm1067_vm3, %v1428_v44 }
 0x3e4   :  { %3177 = vmatmul.msk.bf16.gmra.mxu2 %vm1676_vm7, %v3079_v14 }
 0x3e5   :  { %1398 = vrot.lane.b32.xlu1 %v1374_v19, %s3776_s21  ;;  %1107 = vrot.lane.b32.xlu0 %v1083_v52, %s3774_s25 }
 0x3e7   :  { %v1051_v47 = vpop.f32.mrf.mxu3  ;;  %v1216_v31 = vpop.permute.xlu2 %1215 }
 0x3e9   :  { %v3102_v62 = vld [vmem:[#allocation2 + $0x50] sm:$0xf] }
 0x3ed   :  { %1109 = vrot.lane.b32.xlu1 %v1084_v57, %s3774_s25  ;;  %1164 = vrot.lane.b32.xlu0 %v1139_v10, %s3775_s18 }
 0x3ef   :  { %v1345_v1 = vpop.permute.xlu2 %1344 }
 0x3f5   :  { %1217 = vrot.lane.b32.xlu1 %v1193_v37, %s3776_s21 }
 0x3f7   :  { %v1401_v52 = vpop.permute.xlu2 %1400 }
 0x3fa   :  { %v1054_v58 = vpop.f32.mrf.mxu3 }
 0x3fb   :  { %v1430_v30 = vpack.c.bf16 %v1054_v58, %v1054_v58 }
 0x3fd   :  { %1439 = vst.msk [vmem:[#allocation2 + $0x68] sm:$0xf] %vm1067_vm3, %v1430_v30 }
 0x3ff   :  { %v1163_v23 = vpop.permute.xlu2 %1162 }
 0x402   :  { %v1056_v19 = vpop.f32.mrf.mxu3 }
 0x404   :  { %v1457_v20 = vld [vmem:[#allocation2 + $0x68] sm:$0xf] }
 0x405   :  { %v1542_v57 = vunpack.c.l.b16 %v1457_v20 }
 0x407   :  { %v1557_v43 = vpack.c.b16 %v1542_v57, %v1542_v57  ;;  %v1220_v21 = vpop.permute.xlu2 %1219 }
 0x41f   :  { %v1279_v13 = vpop.permute.xlu0 %1278 }
 0x420   :  { %1305 = vst.msk [vmem:[#allocation2 + $0x4] sm:$0xf] %vm1122_vm4, %v1279_v13  ;;  %v1556_v13 = vpack.c.b16 %v1541_v6, %v1541_v6 }
 0x421   :  { %1359 = vst.msk [vmem:[#allocation2 + $0x4] sm:$0xf] %vm1177_vm5, %v4243_v25  ;;  %v3607_v25 = vld [vmem:[#allocation2 + $0x40] sm:$0xf0] }
 0x422   :  { %1413 = vst.msk [vmem:[#allocation2 + $0x4] sm:$0xf] %vm1232_vm6, %v4311_v15  ;;  %v3091_v15 = vor.u32 %v3607_v25, %v3090_v26  ;;  %v3740_v26 = vld [vmem:[%s5090_s5] ss:$0 sm:$0xff] }
 0x424   :  { %3178 = vmatmul.msk.bf16.gmra.mxu2 %vm1676_vm7, %v3091_v15 }
 0x427   :  { %v1343_v49 = vpop.permute.xlu0 %1342  ;;  %v1281_v5 = vpop.permute.xlu1 %1280 }
 0x428   :  { %1306 = vst.msk [vmem:[#allocation2 + $0x10] sm:$0xf] %vm1122_vm4, %v1281_v5  ;;  %v1701_v5 = vpop.f32.mrf.mxu0 }
 0x429   :  { %1360 = vst.msk [vmem:[#allocation2 + $0x10] sm:$0xf] %vm1177_vm5, %v4217_v60  ;;  %v3599_v9 = vld [vmem:[#allocation2 + $0x4] sm:$0xf]  ;;  %v1702_v25 = vadd.f32 %v3740_v26, %v1701_v5 }
 0x42a   :  { %1414 = vst.msk [vmem:[#allocation2 + $0x10] sm:$0xf] %vm1232_vm6, %v4259_v45  ;;  %v1429_v45 = vpack.c.bf16 %v1051_v47, %v1051_v47 }
 0x42c   :  { %1438 = vst.msk [vmem:[#allocation2 + $0x5c] sm:$0xf] %vm1067_vm3, %v1429_v45 }
 0x42f   :  { %v1289_v48 = vpop.permute.xlu1 %1288  ;;  %v1283_v46 = vpop.permute.xlu0 %1282 }
 0x430   :  { %1310 = vst.msk [vmem:[#allocation2 + $0x40] sm:$0xf] %vm1122_vm4, %v1289_v48  ;;  %v1703_v38 = vpop.f32.mrf.mxu0 }
 0x431   :  { %1364 = vst.msk [vmem:[#allocation2 + $0x40] sm:$0xf] %vm1177_vm5, %v1343_v49  ;;  %v3060_v50 = vld [vmem:[#allocation2 + $0xc] sm:$0xf0] }
 0x432   :  { %1418 = vst.msk [vmem:[#allocation2 + $0x40] sm:$0xf] %vm1232_vm6, %v1397_v11  ;;  %v3063_v60 = vor.u32 %v3599_v9, %v3060_v50 }
 0x433   :  { %1307 = vst.msk [vmem:[#allocation2 + $0x1c] sm:$0xf] %vm1122_vm4, %v1283_v46  ;;  %v3610_v56 = vld [vmem:[#allocation2 + $0x58] sm:$0xf0]  ;;  %v1704_v46 = vadd.f32 %v3740_v26, %v1703_v38 }
 0x434   :  { %1361 = vst.msk [vmem:[#allocation2 + $0x1c] sm:$0xf] %vm1177_vm5, %v4251_v39  ;;  %1733 = vmatmul.bf16.vlgmr.msrb.gmra.mxu3 %v3063_v60  ;;  %v3103_v0 = vor.u32 %v3610_v56, %v3102_v62 }
 0x435   :  { %1415 = vst.msk [vmem:[#allocation2 + $0x1c] sm:$0xf] %vm1232_vm6, %v4322_v51  ;;  %v3072_v51 = vld [vmem:[#allocation2 + $0x24] sm:$0xf0] }
 0x436   :  { %3179 = vmatmul.msk.bf16.gmra.mxu2 %vm1676_vm7, %v3103_v0 }
 0x437   :  { %v1395_v54 = vpop.permute.xlu1 %1394  ;;  %v1104_v59 = vpop.permute.xlu0 %1103 }
 0x438   :  { %1417 = vst.msk [vmem:[#allocation2 + $0x34] sm:$0xf] %vm1232_vm6, %v1395_v54 }
 0x439   :  { %1127 = vst.msk [vmem:[#allocation2 + $0x30] sm:$0xf] %vm1122_vm4, %v1104_v59  ;;  %v3084_v8 = vld [vmem:[#allocation2 + $0x3c] sm:$0xf0] }
 0x43a   :  { %1182 = vst.msk [vmem:[#allocation2 + $0x30] sm:$0xf] %vm1177_vm5, %v1159_v4 }
 0x43c   :  { %v3602_v40 = vld [vmem:[#allocation2 + $0x1c] sm:$0xf] }
 0x43d   :  { %v3075_v53 = vor.u32 %v3602_v40, %v3072_v51 }
 0x43f   :  { %v1106_v35 = vpop.permute.xlu1 %1105  ;;  %v1161_v39 = vpop.permute.xlu0 %1160  ;;  %v3605_v12 = vld [vmem:[#allocation2 + $0x34] sm:$0xf] }
 0x440   :  { %1128 = vst.msk [vmem:[#allocation2 + $0x3c] sm:$0xf] %vm1122_vm4, %v1106_v35  ;;  %v3087_v18 = vor.u32 %v3605_v12, %v3084_v8 }
 0x441   :  { %1183 = vst.msk [vmem:[#allocation2 + $0x3c] sm:$0xf] %vm1177_vm5, %v1161_v39 }
 0x442   :  { %1238 = vst.msk [vmem:[#allocation2 + $0x3c] sm:$0xf] %vm1232_vm6, %v1216_v31 }
 0x444   :  { %1738 = vmatmul.bf16.gmra.mxu3 %v3075_v53 }
 0x446   :  { %3180 = vmatmul.msk.bf16.gmra.mxu2 %vm1676_vm7, %v1557_v43 }
 0x447   :  { %v4499_v3 = vpop.f32.mrf.mxu2  ;;  %v1214_v29 = vpop.permute.xlu1 %1213 }
 0x448   :  { %1237 = vst.msk [vmem:[#allocation2 + $0x30] sm:$0xf] %vm1232_vm6, %v1214_v29  ;;  %v1291_v16 = vpop.permute.xlu0 %1290 }
 0x449   :  { %1311 = vst.msk [vmem:[#allocation2 + $0x4c] sm:$0xf] %vm1122_vm4, %v1291_v16  ;;  %v3606_v63 = vld [vmem:[#allocation2 + $0x38] sm:$0xf0] }
 0x44a   :  { %1365 = vst.msk [vmem:[#allocation2 + $0x4c] sm:$0xf] %vm1177_vm5, %v1345_v1 }
 0x44f   :  { %v1723_v10 = vpop.f32.mrf.mxu2  ;;  %v3082_v37 = vld [vmem:[#allocation2 + $0x30] sm:$0xf]  ;;  %v1293_v17 = vpop.permute.xlu1 %1292 }
 0x450   :  { %v1347_v7 = vpop.permute.xlu0 %1346  ;;  %v3083_v2 = vor.u32 %v3606_v63, %v3082_v37  ;;  %1312 = vst.msk [vmem:[#allocation2 + $0x58] sm:$0xf] %vm1122_vm4, %v1293_v17  ;;  %v1706_v60 = vpop.f32.mrf.mxu0 }
 0x451   :  { %1366 = vst.msk [vmem:[#allocation2 + $0x58] sm:$0xf] %vm1177_vm5, %v1347_v7  ;;  %v1707_v31 = vadd.f32 %v3740_v26, %v1706_v60 }
 0x452   :  { %1710 = vmatmul.bf16.gmra.mxu0 %v3083_v2  ;;  %1420 = vst.msk [vmem:[#allocation2 + $0x58] sm:$0xf] %vm1232_vm6, %v1401_v52 }
 0x454   :  { %1743 = vmatmul.bf16.gmra.mxu3 %v3087_v18 }
 0x457   :  { %v1399_v24 = vpop.permute.xlu1 %1398  ;;  %v1767_v41 = vpop.f32.mrf.mxu2 }
 0x458   :  { %v1108_v27 = vpop.permute.xlu0 %1107  ;;  %1419 = vst.msk [vmem:[#allocation2 + $0x4c] sm:$0xf] %vm1232_vm6, %v1399_v24  ;;  %v1708_v56 = vpop.f32.mrf.mxu0 }
 0x459   :  { %1129 = vst.msk [vmem:[#allocation2 + $0x48] sm:$0xf] %vm1122_vm4, %v1108_v27  ;;  %v3096_v33 = vld [vmem:[#allocation2 + $0x54] sm:$0xf0]  ;;  %v1709_v0 = vadd.f32 %v3740_v26, %v1708_v56 }
 0x45a   :  { %1184 = vst.msk [vmem:[#allocation2 + $0x48] sm:$0xf] %vm1177_vm5, %v1163_v23 }
 0x45f   :  { %v1110_v28 = vpop.permute.xlu1 %1109  ;;  %v3608_v22 = vld [vmem:[#allocation2 + $0x4c] sm:$0xf]  ;;  %v1769_v11 = vpop.f32.mrf.mxu2 }
 0x460   :  { %v1165_v55 = vpop.permute.xlu0 %1164  ;;  %1130 = vst.msk [vmem:[#allocation2 + $0x54] sm:$0xf] %vm1122_vm4, %v1110_v28  ;;  %v3099_v32 = vor.u32 %v3608_v22, %v3096_v33 }
 0x461   :  { %1185 = vst.msk [vmem:[#allocation2 + $0x54] sm:$0xf] %vm1177_vm5, %v1165_v55 }
 0x462   :  { %1240 = vst.msk [vmem:[#allocation2 + $0x54] sm:$0xf] %vm1232_vm6, %v1220_v21 }
 0x464   :  { %1748 = vmatmul.bf16.gmra.mxu3 %v3099_v32  ;;  %v1722_v32 = vadd.f32 %v3740_v26, %v4499_v3 }
 0x467   :  { %v1218_v34 = vpop.permute.xlu1 %1217  ;;  %v1772_v42 = vpop.f32.mrf.mxu2 }
 0x468   :  { %1239 = vst.msk [vmem:[#allocation2 + $0x48] sm:$0xf] %vm1232_vm6, %v1218_v34 }
 0x469   :  { %v3609_v14 = vld [vmem:[#allocation2 + $0x50] sm:$0xf0] }
 0x46f   :  { %v3094_v36 = vld [vmem:[#allocation2 + $0x48] sm:$0xf]  ;;  %v1774_v49 = vpop.f32.mrf.mxu2 }
 0x470   :  { %v3095_v61 = vor.u32 %v3609_v14, %v3094_v36 }
 0x472   :  { %1715 = vmatmul.bf16.gmra.mxu0 %v3095_v61 }
 0x474   :  { %1753 = vmatmul.bf16.gmra.mxu3 %v1556_v13 }
 0x4a7   :  { %v1777_v44 = vpop.f32.mrf.mxu2 }
 0x4af   :  { %v1779_v48 = vpop.f32.mrf.mxu2 }
 0x4b7   :  { %v1734_v15 = vpop.f32.mrf.mxu3 }
 0x4b8   :  { %v1735_v4 = vadd.f32 %v1734_v15, %v1702_v25 }
 0x4b9   :  { %v1782_v54 = vpop.f32.mrf.mxu2 }
 0x4ba   :  { %v1768_v47 = vadd.f32 %v1767_v41, %v1735_v4 }
 0x4bc   :  { %v1791_v20 = vmax.f32 %v1768_v47, 0.0 }
 0x4bf   :  { %v1736_v9 = vpop.f32.mrf.mxu3 }
 0x4c0   :  { %v1737_v50 = vadd.f32 %v1736_v9, %v1704_v46 }
 0x4c1   :  { %v1784_v39 = vpop.f32.mrf.mxu2 }
 0x4c2   :  { %v1770_v45 = vadd.f32 %v1769_v11, %v1737_v50 }
 0x4c4   :  { %v1792_v43 = vmax.f32 %v1770_v45, 0.0 }
 0x4c7   :  { %v1739_v59 = vpop.f32.mrf.mxu3 }
 0x4c8   :  { %v1740_v62 = vadd.f32 %v1739_v59, %v1707_v31 }
 0x4c9   :  { %v1787_v52 = vpop.f32.mrf.mxu2 }
 0x4ca   :  { %v1773_v35 = vadd.f32 %v1772_v42, %v1740_v62 }
 0x4cc   :  { %v1793_v53 = vmax.f32 %v1773_v35, 0.0 }
 0x4ce   :  { %v1804_v29 = vrot.slane %v1793_v53, 2 }
 0x4cf   :  { %v1741_v40 = vpop.f32.mrf.mxu3  ;;  %v1711_v58 = vpop.f32.mrf.mxu0 }
 0x4d0   :  { %v1742_v51 = vadd.f32 %v1741_v40, %v1709_v0  ;;  %v1712_v16 = vadd.f32 %v3740_v26, %v1711_v58  ;;  %v3239_v58 = vld [vmem:[%s5091_s6 + $0x70] sm:$0xf] }
 0x4d1   :  { %v1789_v2 = vpop.f32.mrf.mxu2 }
 0x4d2   :  { %v1775_v1 = vadd.f32 %v1774_v49, %v1742_v51  ;;  %v3690_v2 = vld [vmem:[%s5091_s6 + $0x1e4] sm:$0xf0] }
 0x4d4   :  { %v1794_v30 = vmax.f32 %v1775_v1, 0.0 }
 0x4d6   :  { %v1805_v19 = vrot.slane %v1794_v30, 2  ;;  %v3644_v30 = vld [vmem:[%s5091_s6 + $0x74] sm:$0xf0] }
 0x4d7   :  { %v1744_v57 = vpop.f32.mrf.mxu3  ;;  %v1713_v28 = vpop.f32.mrf.mxu0 }
 0x4d8   :  { %v1806_v10 = vsel %vm1803_vm8, %v1804_v29, %v1805_v19  ;;  %v1745_v37 = vadd.f32 %v1744_v57, %v1712_v16  ;;  %v1714_v6 = vadd.f32 %v3740_v26, %v1713_v28  ;;  %v3240_v29 = vor.u32 %v3644_v30, %v3239_v58  ;;  %v3431_v16 = vld [vmem:[%s5091_s6 + $0x1f0] sm:$0xf]  ;;  %v3656_v30 = vld [vmem:[%s5091_s6 + $0xd4] sm:$0xf0] }
 0x4d9   :  { %v1812_v63 = vmax.f32 %v1791_v20, %v1806_v10  ;;  %v3287_v58 = vld [vmem:[%s5091_s6 + $0xd0] sm:$0xf] }
 0x4da   :  { %v1778_v12 = vadd.f32 %v1777_v44, %v1745_v37  ;;  %2347 = vmatpush.bf16.msra.mxu3 %v3240_v29 }
 0x4dc   :  { %v1795_v17 = vmax.f32 %v1778_v12, 0.0  ;;  %v3642_v12 = vld [vmem:[%s5091_s6 + $0x64] sm:$0xf0] }
 0x4de   :  { %v1807_v7 = vrot.slane %v1795_v17, 2 }
 0x4df   :  { %v1746_v8 = vpop.f32.mrf.mxu3 }
 0x4e0   :  { %v1808_v18 = vsel %vm1803_vm8, %v1805_v19, %v1807_v7  ;;  %v1814_v23 = vmax.f32 %v1793_v53, %v1807_v7  ;;  %v1747_v41 = vadd.f32 %v1746_v8, %v1714_v6  ;;  %v3692_v19 = vld [vmem:[%s5091_s6 + $0x1f4] sm:$0xf0]  ;;  %v3207_v6 = vld [vmem:[%s5091_s6 + $0x30] sm:$0xf] }
 0x4e1   :  { %v1813_v24 = vmax.f32 %v1792_v43, %v1808_v18  ;;  %v3223_v43 = vld [vmem:[%s5091_s6 + $0x50] sm:$0xf]  ;;  %v3640_v8 = vld [vmem:[%s5091_s6 + $0x54] sm:$0xf0] }
 0x4e2   :  { %v1780_v25 = vadd.f32 %v1779_v48, %v1747_v41 }
 0x4e4   :  { %v1796_v3 = vmax.f32 %v1780_v25, 0.0  ;;  %v3191_v25 = vld [vmem:[%s5091_s6 + $0x10] sm:$0xf] }
 0x4e7   :  { %v1749_v27 = vpop.f32.mrf.mxu3 }
 0x4ef   :  { %v1751_v55 = vpop.f32.mrf.mxu3  ;;  %v1716_v22 = vpop.f32.mrf.mxu0 }
 0x4f0   :  { %v1717_v33 = vadd.f32 %v3740_v26, %v1716_v22  ;;  %v3638_v22 = vld [vmem:[%s5091_s6 + $0x44] sm:$0xf0] }
 0x4f2   :  { %v1750_v21 = vadd.f32 %v1749_v27, %v1717_v33  ;;  %v3224_v27 = vor.u32 %v3640_v8, %v3223_v43  ;;  %v3407_v33 = vld [vmem:[%s5091_s6 + $0x1c0] sm:$0xf]  ;;  %v3652_v43 = vld [vmem:[%s5091_s6 + $0xb4] sm:$0xf0] }
 0x4f4   :  { %v1783_v61 = vadd.f32 %v1782_v54, %v1750_v21  ;;  %v3686_v21 = vld [vmem:[%s5091_s6 + $0x1c4] sm:$0xf0] }
 0x4f6   :  { %v1797_v5 = vmax.f32 %v1783_v61, 0.0  ;;  %v3684_v61 = vld [vmem:[%s5091_s6 + $0x1b4] sm:$0xf0] }
 0x4f7   :  { %v1754_v34 = vpop.f32.mrf.mxu3  ;;  %v1718_v36 = vpop.f32.mrf.mxu0 }
 0x4f8   :  { %v1755_v14 = vadd.f32 %v1754_v34, %v1722_v32  ;;  %v1719_v13 = vadd.f32 %v3740_v26, %v1718_v36  ;;  %v1818_v46 = vrot.slane %v1797_v5, 2  ;;  %v3408_v34 = vor.u32 %v3686_v21, %v3407_v33  ;;  %v3636_v36 = vld [vmem:[%s5091_s6 + $0x34] sm:$0xf0]  ;;  %v3633_v33 = vld [vmem:[%s5091_s6 + $0x24] sm:$0xf] }
 0x4f9   :  { %v3201_v21 = vld [vmem:[%s5091_s6 + $0x28] sm:$0xf0] }
 0x4fa   :  { %v1788_v11 = vadd.f32 %v1787_v52, %v1755_v14  ;;  %v1752_v42 = vadd.f32 %v1751_v55, %v1719_v13  ;;  %v3432_v52 = vor.u32 %v3692_v19, %v3431_v16  ;;  %v3215_v55 = vld [vmem:[%s5091_s6 + $0x40] sm:$0xf]  ;;  %v3399_v14 = vld [vmem:[%s5091_s6 + $0x1b0] sm:$0xf]  ;;  %v3208_v13 = vor.u32 %v3636_v36, %v3207_v6  ;;  %v3639_v19 = vld [vmem:[%s5091_s6 + $0x54] sm:$0xf] }
 0x4fb   :  { %v3216_v32 = vor.u32 %v3638_v22, %v3215_v55  ;;  %v3400_v41 = vor.u32 %v3684_v61, %v3399_v14  ;;  %v3648_v6 = vld [vmem:[%s5091_s6 + $0x94] sm:$0xf0]  ;;  %v3631_v14 = vld [vmem:[%s5091_s6 + $0x14] sm:$0xf]  ;;  %v3193_v61 = vld [vmem:[%s5091_s6 + $0x18] sm:$0xf0] }
 0x4fc   :  { %v1799_v49 = vmax.f32 %v1788_v11, 0.0  ;;  %v1785_v44 = vadd.f32 %v1784_v39, %v1752_v42  ;;  %2386 = vmatpush.bf16.msrb.mxu2 %v3432_v52  ;;  %v3199_v11 = vld [vmem:[%s5091_s6 + $0x20] sm:$0xf]  ;;  %v3634_v42 = vld [vmem:[%s5091_s6 + $0x24] sm:$0xf0] }
 0x4fd   :  { %v3225_v52 = vld [vmem:[%s5091_s6 + $0x58] sm:$0xf0] }
 0x4fe   :  { %v1821_v15 = vrot.slane %v1799_v49, 2  ;;  %v1798_v4 = vmax.f32 %v1785_v44, 0.0  ;;  %v3391_v49 = vld [vmem:[%s5091_s6 + $0x1a0] sm:$0xf]  ;;  %v3682_v44 = vld [vmem:[%s5091_s6 + $0x1a4] sm:$0xf0] }
 0x4ff   :  { %v1756_v38 = vpop.f32.mrf.mxu3 }
 0x500   :  { %v1828_v47 = vmax.f32 %v1797_v5, %v1821_v15  ;;  %v1819_v9 = vrot.slane %v1798_v4, 2  ;;  %v3200_v5 = vor.u32 %v3634_v42, %v3199_v11  ;;  %v3392_v4 = vor.u32 %v3682_v44, %v3391_v49  ;;  %v3383_v38 = vld [vmem:[%s5091_s6 + $0x190] sm:$0xf]  ;;  %v3646_v11 = vld [vmem:[%s5091_s6 + $0x84] sm:$0xf0] }
 0x501   :  { %v3629_v49 = vld [vmem:[%s5091_s6 + $0x4] sm:$0xf] }
 0x502   :  { %v1835_v50 = vrot.slane %v1828_v47, 4  ;;  %v1820_v60 = vsel %vm1803_vm8, %v1818_v46, %v1819_v9  ;;  %v1822_v45 = vsel %vm1803_vm8, %v1819_v9, %v1821_v15  ;;  %v3632_v15 = vld [vmem:[%s5091_s6 + $0x14] sm:$0xf0] }
 0x503   :  { %v1826_v26 = vmax.f32 %v1795_v17, %v1820_v60  ;;  %v1827_v54 = vmax.f32 %v1796_v3, %v1822_v45  ;;  %v3423_v17 = vld [vmem:[%s5091_s6 + $0x1e0] sm:$0xf]  ;;  %v3680_v47 = vld [vmem:[%s5091_s6 + $0x194] sm:$0xf0]  ;;  %v3192_v46 = vor.u32 %v3632_v15, %v3191_v25  ;;  %v3303_v60 = vld [vmem:[%s5091_s6 + $0xf0] sm:$0xf] }
 0x504   :  { %v1842_v59 = vmax.f32 %v1814_v23, %v1835_v50  ;;  %v3424_v18 = vor.u32 %v3690_v2, %v3423_v17  ;;  %v3415_v23 = vld [vmem:[%s5091_s6 + $0x1d0] sm:$0xf]  ;;  %v3384_v9 = vor.u32 %v3680_v47, %v3383_v38  ;;  %v3183_v3 = vld [vmem:[%s5091_s6] sm:$0xf]  ;;  %v3660_v45 = vld [vmem:[%s5091_s6 + $0xf4] sm:$0xf0] }
 0x505   :  { %v1832_v31 = vrot.slane %v1826_v26, 4  ;;  %v1833_v62 = vrot.slane %v1827_v54, 4  ;;  %v3375_v26 = vld [vmem:[%s5091_s6 + $0x180] sm:$0xf]  ;;  %v3678_v54 = vld [vmem:[%s5091_s6 + $0x184] sm:$0xf0] }
 0x506   :  { %v1893_v56 = vpack.c.bf16 %v1842_v59, %v1842_v59  ;;  %2387 = vmatpush.bf16.msrb.mxu2 %v3424_v18  ;;  %v3643_v59 = vld [vmem:[%s5091_s6 + $0x74] sm:$0xf]  ;;  %v3217_v17 = vld [vmem:[%s5091_s6 + $0x48] sm:$0xf0]  ;;  %v3271_v2 = vld [vmem:[%s5091_s6 + $0xb0] sm:$0xf] }
 0x507   :  { %v1834_v48 = vsel %vm841_vm1, %v1832_v31, %v1833_v62  ;;  %v1836_v0 = vsel %vm841_vm1, %v1833_v62, %v1835_v50  ;;  %v3630_v50 = vld [vmem:[%s5091_s6 + $0x4] sm:$0xf0]  ;;  %v3241_v31 = vld [vmem:[%s5091_s6 + $0x78] sm:$0xf0]  ;;  %v3272_v8 = vor.u32 %v3652_v43, %v3271_v2  ;;  %v3635_v18 = vld [vmem:[%s5091_s6 + $0x34] sm:$0xf] }
 0x508   :  { %1894 = vst.msk [vmem:[#allocation3 + $0x4] sm:$0x1] %vm1844_vm9, %v1893_v56  ;;  %v1840_v35 = vmax.f32 %v1812_v63, %v1834_v48  ;;  %v1841_v39 = vmax.f32 %v1813_v24, %v1836_v0  ;;  %v3231_v63 = vld [vmem:[%s5091_s6 + $0x60] sm:$0xf]  ;;  %v3688_v24 = vld [vmem:[%s5091_s6 + $0x1d4] sm:$0xf0]  ;;  %v3184_v62 = vor.u32 %v3630_v50, %v3183_v3  ;;  %v3304_v56 = vor.u32 %v3660_v45, %v3303_v60 }
 0x509   :  { %v3232_v7 = vor.u32 %v3642_v12, %v3231_v63  ;;  %v3416_v28 = vor.u32 %v3688_v24, %v3415_v23  ;;  %v3376_v48 = vor.u32 %v3678_v54, %v3375_v26  ;;  %v3244_v0 = vor.u32 %v3643_v59, %v3241_v31  ;;  %v3637_v12 = vld [vmem:[%s5091_s6 + $0x44] sm:$0xf]  ;;  %v3209_v23 = vld [vmem:[%s5091_s6 + $0x38] sm:$0xf0]  ;;  %v3676_v38 = vld [vmem:[%s5091_s6 + $0x174] sm:$0xf0] }
 0x50a   :  { %v1843_v40 = vpack.c.bf16 %v1840_v35, %v1840_v35  ;;  %v1869_v51 = vpack.c.bf16 %v1841_v39, %v1841_v39  ;;  %v3295_v35 = vld [vmem:[%s5091_s6 + $0xe0] sm:$0xf]  ;;  %v3658_v39 = vld [vmem:[%s5091_s6 + $0xe4] sm:$0xf0]  ;;  %v3212_v24 = vor.u32 %v3635_v18, %v3209_v23  ;;  %v3675_v47 = vld [vmem:[%s5091_s6 + $0x174] sm:$0xf] }
 0x50b   :  { %2348 = vmatpush.bf16.msra.mxu3 %v3232_v7  ;;  %2388 = vmatpush.bf16.msrb.mxu2 %v3416_v28  ;;  %v3220_v7 = vor.u32 %v3637_v12, %v3217_v17  ;;  %v3650_v28 = vld [vmem:[%s5091_s6 + $0xa4] sm:$0xf0]  ;;  %v3359_v50 = vld [vmem:[%s5091_s6 + $0x160] sm:$0xf]  ;;  %v3673_v45 = vld [vmem:[%s5091_s6 + $0x164] sm:$0xf] }
 0x50c   :  { %1847 = vst [vmem:[#allocation1] sm:$0xff] %v1843_v40  ;;  %v3674_v60 = vld [vmem:[%s5091_s6 + $0x164] sm:$0xf0]  ;;  %v3361_v26 = vld [vmem:[%s5091_s6 + $0x168] sm:$0xf0] }
 0x50d   :  { %1845 = vst.msk [vmem:[#allocation3] sm:$0x1] %vm1844_vm9, %v1843_v40  ;;  %v3360_v31 = vor.u32 %v3674_v60, %v3359_v50  ;;  %v3665_v12 = vld [vmem:[%s5091_s6 + $0x124] sm:$0xf]  ;;  %v3329_v17 = vld [vmem:[%s5091_s6 + $0x128] sm:$0xf0] }
 0x50e   :  { %1870 = vst.msk [vmem:[#allocation3 + $0x2] sm:$0x1] %vm1844_vm9, %v1869_v51  ;;  %v3332_v43 = vor.u32 %v3665_v12, %v3329_v17  ;;  %v3664_v18 = vld [vmem:[%s5091_s6 + $0x114] sm:$0xf0]  ;;  %v3663_v23 = vld [vmem:[%s5091_s6 + $0x114] sm:$0xf] }
 0x50f   :  { %2349 = vmatpush.bf16.msra.mxu3 %v3224_v27  ;;  %2389 = vmatpush.bf16.msrb.mxu2 %v3408_v34  ;;  %v3263_v27 = vld [vmem:[%s5091_s6 + $0xa0] sm:$0xf]  ;;  %v3255_v34 = vld [vmem:[%s5091_s6 + $0x90] sm:$0xf]  ;;  %v3694_v60 = vld [vmem:[%s5091_s6 + $0x204] sm:$0xf0] }
 0x510   :  { %v3264_v22 = vor.u32 %v3650_v28, %v3263_v27  ;;  %v3256_v36 = vor.u32 %v3648_v6, %v3255_v34  ;;  %v3700_v34 = vld [vmem:[%s5091_s6 + $0x234] sm:$0xf0]  ;;  %v3699_v6 = vld [vmem:[%s5091_s6 + $0x234] sm:$0xf]  ;;  %v3645_v17 = vld [vmem:[%s5091_s6 + $0x84] sm:$0xf] }
 0x513   :  { %v1849_v53 = vld [vmem:[#allocation1 + $0x1] ss:$4 sm:$0xff]  ;;  %2350 = vmatpush.bf16.msra.mxu3 %v3216_v32  ;;  %2390 = vmatpush.bf16.msrb.mxu2 %v3400_v41  ;;  %v3204_v32 = vor.u32 %v3633_v33, %v3201_v21 }
 0x514   :  { %1851 = vrot.lane.b32.xlu0 %v1849_v53, %s3775_s18  ;;  %1856 = vst [vmem:[#allocation1] sm:$0xff] %v1843_v40  ;;  %v3296_v53 = vor.u32 %v3658_v39, %v3295_v35  ;;  %v3247_v41 = vld [vmem:[%s5091_s6 + $0x80] sm:$0xf]  ;;  %v3353_v35 = vld [vmem:[%s5091_s6 + $0x158] sm:$0xf0] }
 0x515   :  { %v3248_v42 = vor.u32 %v3646_v11, %v3247_v41  ;;  %v3463_v33 = vld [vmem:[%s5091_s6 + $0x230] sm:$0xf]  ;;  %v3661_v21 = vld [vmem:[%s5091_s6 + $0x104] sm:$0xf]  ;;  %v3455_v41 = vld [vmem:[%s5091_s6 + $0x220] sm:$0xf] }
 0x517   :  { %2351 = vmatpush.bf16.msra.mxu3 %v3208_v13  ;;  %2391 = vmatpush.bf16.msrb.mxu2 %v3392_v4  ;;  %v3196_v13 = vor.u32 %v3631_v14, %v3193_v61  ;;  %v3367_v4 = vld [vmem:[%s5091_s6 + $0x170] sm:$0xf] }
 0x51b   :  { %v1858_v1 = vld [vmem:[#allocation1 + $0x2] ss:$4 sm:$0xff]  ;;  %2352 = vmatpush.bf16.msra.mxu3 %v3200_v5  ;;  %2392 = vmatpush.bf16.msrb.mxu2 %v3384_v9  ;;  %v3368_v9 = vor.u32 %v3676_v38, %v3367_v4 }
 0x51c   :  { %1861 = vst [vmem:[#allocation1] sm:$0xff] %v1843_v40  ;;  %v3641_v40 = vld [vmem:[%s5091_s6 + $0x64] sm:$0xf]  ;;  %v3185_v5 = vld [vmem:[%s5091_s6 + $0x8] sm:$0xf0] }
 0x51d   :  { %1860 = vst.msk [vmem:[#allocation3 + $0x1] sm:$0x1] %vm1844_vm9, %v1858_v1  ;;  %v3188_v44 = vor.u32 %v3629_v49, %v3185_v5  ;;  %v3697_v49 = vld [vmem:[%s5091_s6 + $0x224] sm:$0xf]  ;;  %v3457_v5 = vld [vmem:[%s5091_s6 + $0x228] sm:$0xf0] }
 0x51e   :  { %v3460_v4 = vor.u32 %v3697_v49, %v3457_v5  ;;  %v3696_v38 = vld [vmem:[%s5091_s6 + $0x214] sm:$0xf0]  ;;  %v3677_v49 = vld [vmem:[%s5091_s6 + $0x184] sm:$0xf]  ;;  %v3377_v5 = vld [vmem:[%s5091_s6 + $0x188] sm:$0xf0] }
 0x51f   :  { %2353 = vmatpush.bf16.msra.mxu3 %v3192_v46  ;;  %2393 = vmatpush.bf16.msrb.mxu2 %v3376_v48  ;;  %v3369_v46 = vld [vmem:[%s5091_s6 + $0x178] sm:$0xf0]  ;;  %v3672_v48 = vld [vmem:[%s5091_s6 + $0x154] sm:$0xf0] }
 0x520   :  { %v3372_v3 = vor.u32 %v3675_v47, %v3369_v46  ;;  %v3695_v47 = vld [vmem:[%s5091_s6 + $0x214] sm:$0xf]  ;;  %v3449_v46 = vld [vmem:[%s5091_s6 + $0x218] sm:$0xf0] }
 0x521   :  { %v3452_v50 = vor.u32 %v3695_v47, %v3449_v46  ;;  %v3706_v47 = vld [vmem:[%s5093_s8 + $0x28] sm:$0xff] }
 0x523   :  { %v1863_v20 = vld [vmem:[#allocation1 + $0x3] ss:$4 sm:$0xff]  ;;  %2354 = vmatpush.bf16.msra.mxu3 %v3184_v62  ;;  %2412 = vmatpush.bf16.msra.mxu2 %v3244_v0  ;;  %v3364_v62 = vor.u32 %v3673_v45, %v3361_v26 }
 0x524   :  { %1865 = vrot.lane.b32.xlu1 %v1863_v20, %s3775_s18  ;;  %1872 = vst [vmem:[#allocation1] sm:$0xff] %v1869_v51  ;;  %v3288_v20 = vor.u32 %v3656_v30, %v3287_v58  ;;  %v3671_v0 = vld [vmem:[%s5091_s6 + $0x154] sm:$0xf]  ;;  %v3345_v58 = vld [vmem:[%s5091_s6 + $0x148] sm:$0xf0] }
 0x525   :  { %v3693_v45 = vld [vmem:[%s5091_s6 + $0x204] sm:$0xf]  ;;  %v3441_v26 = vld [vmem:[%s5091_s6 + $0x208] sm:$0xf0] }
 0x527   :  { %2360 = vmatpush.bf16.msrb.mxu3 %v3304_v56  ;;  %v3351_v56 = vld [vmem:[%s5091_s6 + $0x150] sm:$0xf] }
 0x528   :  { %v3352_v39 = vor.u32 %v3672_v48, %v3351_v56  ;;  %v3444_v56 = vor.u32 %v3693_v45, %v3441_v26 }
 0x52b   :  { %v1874_v57 = vld [vmem:[#allocation1 + $0x1] ss:$4 sm:$0xff]  ;;  %2361 = vmatpush.bf16.msrb.mxu3 %v3296_v53 }
 0x52c   :  { %1876 = vrot.lane.b32.xlu2 %v1874_v57, %s3775_s18  ;;  %1880 = vst [vmem:[#allocation1] sm:$0xff] %v1869_v51  ;;  %v3228_v57 = vor.u32 %v3639_v19, %v3225_v52  ;;  %v3670_v53 = vld [vmem:[%s5091_s6 + $0x144] sm:$0xf0]  ;;  %v3668_v19 = vld [vmem:[%s5091_s6 + $0x134] sm:$0xf0] }
 0x52d   :  { %v3667_v52 = vld [vmem:[%s5091_s6 + $0x134] sm:$0xf] }
 0x52f   :  { %2362 = vmatpush.bf16.msrb.mxu3 %v3288_v20  ;;  %v3337_v20 = vld [vmem:[%s5091_s6 + $0x138] sm:$0xf0] }
 0x533   :  { %v1882_v10 = vld [vmem:[#allocation1 + $0x2] ss:$4 sm:$0xff] }
 0x534   :  { %1885 = vst [vmem:[#allocation1] sm:$0xff] %v1869_v51  ;;  %v3233_v51 = vld [vmem:[%s5091_s6 + $0x68] sm:$0xf0] }
 0x535   :  { %1884 = vst.msk [vmem:[#allocation3 + $0x3] sm:$0x1] %vm1844_vm9, %v1882_v10  ;;  %v3236_v1 = vor.u32 %v3641_v40, %v3233_v51  ;;  %v3279_v10 = vld [vmem:[%s5091_s6 + $0xc0] sm:$0xf]  ;;  %v3356_v40 = vor.u32 %v3671_v0, %v3353_v35  ;;  %v3657_v0 = vld [vmem:[%s5091_s6 + $0xe4] sm:$0xf] }
 0x536   :  { %v3343_v51 = vld [vmem:[%s5091_s6 + $0x140] sm:$0xf]  ;;  %v3297_v35 = vld [vmem:[%s5091_s6 + $0xe8] sm:$0xf0] }
 0x537   :  { %2413 = vmatpush.bf16.msra.mxu2 %v3236_v1  ;;  %v3669_v1 = vld [vmem:[%s5091_s6 + $0x144] sm:$0xf]  ;;  %v3344_v30 = vor.u32 %v3670_v53, %v3343_v51  ;;  %v3289_v51 = vld [vmem:[%s5091_s6 + $0xd8] sm:$0xf0] }
 0x53b   :  { %v1887_v37 = vld [vmem:[#allocation1 + $0x3] ss:$4 sm:$0xff]  ;;  %2414 = vmatpush.bf16.msra.mxu2 %v3228_v57 }
 0x53c   :  { %1889 = vrot.lane.b32.xlu0 %v1887_v37, %s3775_s18  ;;  %v3654_v37 = vld [vmem:[%s5091_s6 + $0xc4] sm:$0xf0] }
 0x53d   :  { %v3280_v63 = vor.u32 %v3654_v37, %v3279_v10  ;;  %v3340_v10 = vor.u32 %v3667_v52, %v3337_v20  ;;  %v3327_v37 = vld [vmem:[%s5091_s6 + $0x120] sm:$0xf]  ;;  %v3649_v20 = vld [vmem:[%s5091_s6 + $0xa4] sm:$0xf] }
 0x53f   :  { %2363 = vmatpush.bf16.msrb.mxu3 %v3280_v63  ;;  %2415 = vmatpush.bf16.msra.mxu2 %v3220_v7  ;;  %v3666_v63 = vld [vmem:[%s5091_s6 + $0x124] sm:$0xf0] }
 0x540   :  { %v3328_v2 = vor.u32 %v3666_v63, %v3327_v37  ;;  %v3647_v37 = vld [vmem:[%s5091_s6 + $0x94] sm:$0xf]  ;;  %v3257_v63 = vld [vmem:[%s5091_s6 + $0x98] sm:$0xf0] }
 0x541   :  { %v3260_v12 = vor.u32 %v3647_v37, %v3257_v63  ;;  %v3711_v37 = vld [vmem:[%s5093_s8 + $0x50] sm:$0xff] }
 0x543   :  { %2364 = vmatpush.bf16.msrb.mxu3 %v3272_v8  ;;  %2416 = vmatpush.bf16.msra.mxu2 %v3212_v24  ;;  %v3319_v8 = vld [vmem:[%s5091_s6 + $0x110] sm:$0xf]  ;;  %v3321_v24 = vld [vmem:[%s5091_s6 + $0x118] sm:$0xf0] }
 0x544   :  { %v3320_v27 = vor.u32 %v3664_v18, %v3319_v8  ;;  %v3324_v28 = vor.u32 %v3663_v23, %v3321_v24  ;;  %v3433_v8 = vld [vmem:[%s5091_s6 + $0x1f8] sm:$0xf0]  ;;  %v3689_v24 = vld [vmem:[%s5091_s6 + $0x1e4] sm:$0xf] }
 0x547   :  { %2365 = vmatpush.bf16.msrb.mxu3 %v3264_v22  ;;  %2417 = vmatpush.bf16.msra.mxu2 %v3204_v32  ;;  %v3662_v22 = vld [vmem:[%s5091_s6 + $0x104] sm:$0xf0]  ;;  %v3313_v32 = vld [vmem:[%s5091_s6 + $0x108] sm:$0xf0] }
 0x548   :  { %v3316_v61 = vor.u32 %v3661_v21, %v3313_v32  ;;  %v3685_v21 = vld [vmem:[%s5091_s6 + $0x1c4] sm:$0xf]  ;;  %v3409_v32 = vld [vmem:[%s5091_s6 + $0x1c8] sm:$0xf0] }
 0x54b   :  { %2366 = vmatpush.bf16.msrb.mxu3 %v3256_v36  ;;  %2418 = vmatpush.bf16.msra.mxu2 %v3196_v13  ;;  %v3465_v36 = vld [vmem:[%s5091_s6 + $0x238] sm:$0xf0]  ;;  %v3464_v13 = vor.u32 %v3700_v34, %v3463_v33  ;;  %v3412_v34 = vor.u32 %v3685_v21, %v3409_v32 }
 0x54c   :  { %v3468_v11 = vor.u32 %v3699_v6, %v3465_v36  ;;  %v3683_v6 = vld [vmem:[%s5091_s6 + $0x1b4] sm:$0xf] }
 0x54f   :  { %2367 = vmatpush.bf16.msrb.mxu3 %v3248_v42  ;;  %2419 = vmatpush.bf16.msra.mxu2 %v3188_v44  ;;  %v3698_v42 = vld [vmem:[%s5091_s6 + $0x224] sm:$0xf0] }
 0x586   :  { %v1852_v29 = vpop.permute.xlu0 %1851  ;;  %v1877_v16 = vpop.permute.xlu2 %1876 }
 0x587   :  { %1855 = vst.msk [vmem:[#allocation3] sm:$0x1] %vm1854_vm10, %v1852_v29  ;;  %v3348_v29 = vor.u32 %v3669_v1, %v3345_v58  ;;  %v3653_v58 = vld [vmem:[%s5091_s6 + $0xc4] sm:$0xf] }
 0x588   :  { %1879 = vst.msk [vmem:[#allocation3 + $0x2] sm:$0x1] %vm1854_vm10, %v1877_v16  ;;  %v3335_v16 = vld [vmem:[%s5091_s6 + $0x130] sm:$0xf] }
 0x589   :  { %v3336_v57 = vor.u32 %v3668_v19, %v3335_v16  ;;  %v3651_v16 = vld [vmem:[%s5091_s6 + $0xb4] sm:$0xf]  ;;  %v3273_v19 = vld [vmem:[%s5091_s6 + $0xb8] sm:$0xf0] }
 0x58a   :  { %v3276_v52 = vor.u32 %v3651_v16, %v3273_v19  ;;  %v3712_v19 = vld [vmem:[%s5093_s8 + $0x58] sm:$0xff] }
 0x596   :  { %v1866_v55 = vpop.permute.xlu1 %1865 }
 0x597   :  { %1868 = vst.msk [vmem:[#allocation3 + $0x1] sm:$0x1] %vm1854_vm10, %v1866_v55  ;;  %v3311_v55 = vld [vmem:[%s5091_s6 + $0x100] sm:$0xf] }
 0x598   :  { %v3312_v14 = vor.u32 %v3662_v22, %v3311_v55  ;;  %v3687_v55 = vld [vmem:[%s5091_s6 + $0x1d4] sm:$0xf]  ;;  %v3417_v22 = vld [vmem:[%s5091_s6 + $0x1d8] sm:$0xf0] }
 0x599   :  { %v3420_v33 = vor.u32 %v3687_v55, %v3417_v22 }
 0x5ae   :  { %v1890_v25 = vpop.permute.xlu0 %1889 }
 0x5af   :  { %1892 = vst.msk [vmem:[#allocation3 + $0x3] sm:$0x1] %vm1854_vm10, %v1890_v25  ;;  %v3456_v25 = vor.u32 %v3698_v42, %v3455_v41  ;;  %v3679_v41 = vld [vmem:[%s5091_s6 + $0x194] sm:$0xf] }
 0x5b6   :  { %v1895_v15 = vld [vmem:[#allocation3] sm:$0x1f] }
 0x5b7   :  { %1975 = vst [vmem:[#allocation1] ss:$9 sm:$0xff] %v1895_v15  ;;  %v3447_v15 = vld [vmem:[%s5091_s6 + $0x210] sm:$0xf] }
 0x5be   :  { %v1976_v54 = vld [vmem:[#allocation1] sm:$0xff]  ;;  %v4806_v7 = vld [vmem:[#allocation1 + $0x9] sm:$0xff]  ;;  %v1978_v44 = vld [vmem:[#allocation1 + $0x12] sm:$0xff] }
 0x5bf   :  { %v4755_v59 = vld [vmem:[#allocation1 + $0x1b] sm:$0xff]  ;;  %2355 = vmatmul.bf16.vlgmr.msra.gmra.mxu3 %v1976_v54  ;;  %v1980_v53 = vld [vmem:[#allocation1 + $0x24] sm:$0xff] }
 0x5c0   :  { %2394 = vmatmul.bf16.vlgmr.msrb.gmra.mxu2 %v4755_v59  ;;  %2373 = vmatpush.bf16.msra.mxu3 %v3368_v9  ;;  %v3448_v9 = vor.u32 %v3696_v38, %v3447_v15  ;;  %v3707_v15 = vld [vmem:[%s5093_s8 + $0x30] sm:$0xff] }
 0x5c1   :  { %2438 = vmatpush.bf16.msrb.mxu2 %v3372_v3  ;;  %v3439_v3 = vld [vmem:[%s5091_s6 + $0x200] sm:$0xf] }
 0x5c4   :  { %2374 = vmatpush.bf16.msra.mxu3 %v3360_v31  ;;  %v3305_v31 = vld [vmem:[%s5091_s6 + $0xf8] sm:$0xf0] }
 0x5c5   :  { %2439 = vmatpush.bf16.msrb.mxu2 %v3364_v62  ;;  %v3440_v62 = vor.u32 %v3694_v60, %v3439_v3  ;;  %v3704_v3 = vld [vmem:[%s5093_s8 + $0x18] sm:$0xff]  ;;  %v3703_v60 = vld [vmem:[%s5093_s8 + $0x10] sm:$0xff] }
 0x5c8   :  { %2375 = vmatpush.bf16.msra.mxu3 %v3352_v39  ;;  %v3300_v39 = vor.u32 %v3657_v0, %v3297_v35  ;;  %v3714_v0 = vld [vmem:[%s5093_s8 + $0x68] sm:$0xff]  ;;  %v3713_v35 = vld [vmem:[%s5093_s8 + $0x60] sm:$0xff] }
 0x5c9   :  { %2440 = vmatpush.bf16.msrb.mxu2 %v3356_v40  ;;  %v3655_v40 = vld [vmem:[%s5091_s6 + $0xd4] sm:$0xf] }
 0x5ca   :  { %v3292_v1 = vor.u32 %v3655_v40, %v3289_v51 }
 0x5cc   :  { %2376 = vmatpush.bf16.msra.mxu3 %v3344_v30  ;;  %v3281_v30 = vld [vmem:[%s5091_s6 + $0xc8] sm:$0xf0] }
 0x5cd   :  { %2441 = vmatpush.bf16.msrb.mxu2 %v3348_v29  ;;  %v3284_v29 = vor.u32 %v3653_v58, %v3281_v30 }
 0x5cf   :  { %2368 = vmatmul.bf16.vlgmr.msrb.gmra.mxu3 %v4806_v7 }
 0x5d0   :  { %2420 = vmatmul.bf16.vlgmr.msra.gmra.mxu2 %v1976_v54  ;;  %2377 = vmatpush.bf16.msra.mxu3 %v3336_v57  ;;  %v3659_v54 = vld [vmem:[%s5091_s6 + $0xf4] sm:$0xf]  ;;  %v3265_v57 = vld [vmem:[%s5091_s6 + $0xa8] sm:$0xf0] }
 0x5d1   :  { %2442 = vmatpush.bf16.msrb.mxu2 %v3340_v10  ;;  %v3308_v48 = vor.u32 %v3659_v54, %v3305_v31  ;;  %v3268_v10 = vor.u32 %v3649_v20, %v3265_v57  ;;  %v3702_v54 = vld [vmem:[%s5093_s8 + $0x8] sm:$0xff]  ;;  %v3701_v31 = vld [vmem:[%s5093_s8] sm:$0xff] }
 0x5d4   :  { %2378 = vmatpush.bf16.msra.mxu3 %v3328_v2  ;;  %v3249_v2 = vld [vmem:[%s5091_s6 + $0x88] sm:$0xf0] }
 0x5d5   :  { %2443 = vmatpush.bf16.msrb.mxu2 %v3332_v43  ;;  %v3691_v43 = vld [vmem:[%s5091_s6 + $0x1f4] sm:$0xf]  ;;  %v3252_v18 = vor.u32 %v3645_v17, %v3249_v2 }
 0x5d6   :  { %v3436_v23 = vor.u32 %v3691_v43, %v3433_v8 }
 0x5d8   :  { %2379 = vmatpush.bf16.msra.mxu3 %v3320_v27  ;;  %v3425_v27 = vld [vmem:[%s5091_s6 + $0x1e8] sm:$0xf0] }
 0x5d9   :  { %2444 = vmatpush.bf16.msrb.mxu2 %v3324_v28  ;;  %v3428_v28 = vor.u32 %v3689_v24, %v3425_v27  ;;  %v3709_v27 = vld [vmem:[%s5093_s8 + $0x40] sm:$0xff] }
 0x5dc   :  { %2380 = vmatpush.bf16.msra.mxu3 %v3312_v14  ;;  %v3681_v14 = vld [vmem:[%s5091_s6 + $0x1a4] sm:$0xf] }
 0x5dd   :  { %2445 = vmatpush.bf16.msrb.mxu2 %v3316_v61  ;;  %v3393_v61 = vld [vmem:[%s5091_s6 + $0x1a8] sm:$0xf0] }
 0x5df   :  { %2381 = vmatmul.bf16.vlgmr.msra.gmra.mxu3 %v1978_v44 }
 0x5e0   :  { %2403 = vmatpush.bf16.msrb.mxu3 %v3464_v13  ;;  %2446 = vmatmul.bf16.vlgmr.msrb.gmra.mxu2 %v1978_v44  ;;  %v3396_v13 = vor.u32 %v3681_v14, %v3393_v61  ;;  %v3380_v44 = vor.u32 %v3677_v49, %v3377_v5  ;;  %v2641_v14 = vld [vmem:[%s5095_s10 + $0x8] sm:$0xff]  ;;  %v2676_v5 = vld [vmem:[%s5097_s12 + $0x20] sm:$0xff] }
 0x5e1   :  { %2468 = vmatpush.bf16.msra.mxu2 %v3468_v11  ;;  %v3385_v11 = vld [vmem:[%s5091_s6 + $0x198] sm:$0xf0]  ;;  %v2677_v49 = vld [vmem:[%s5097_s12 + $0x28] sm:$0xff] }
 0x5e2   :  { %v3388_v42 = vor.u32 %v3679_v41, %v3385_v11  ;;  %v2640_v41 = vld [vmem:[%s5095_s10] sm:$0xff]  ;;  %v2679_v11 = vld [vmem:[%s5097_s12 + $0x38] sm:$0xff] }
 0x5e4   :  { %2404 = vmatpush.bf16.msrb.mxu3 %v3456_v25  ;;  %v3708_v25 = vld [vmem:[%s5093_s8 + $0x38] sm:$0xff] }
 0x5e5   :  { %2469 = vmatpush.bf16.msra.mxu2 %v3460_v4 }
 0x5e8   :  { %2405 = vmatpush.bf16.msrb.mxu3 %v3448_v9 }
 0x5e9   :  { %2470 = vmatpush.bf16.msra.mxu2 %v3452_v50  ;;  %v3716_v50 = vld [vmem:[%s5093_s8 + $0x78] sm:$0xff] }
 0x5ea   :  { %2626 = vmatpush.bf16.msra.mxu0 %v3716_v50  ;;  %v3742_v50 = vld [vmem:[%s5096_s11] ss:$0 sm:$0xff]  ;;  %s3777_s11 = smov [#allocation4]  }
 0x5ec   :  { %2406 = vmatpush.bf16.msrb.mxu3 %v3440_v62  ;;  %v3715_v62 = vld [vmem:[%s5093_s8 + $0x70] sm:$0xff] }
 0x5ed   :  { %2471 = vmatpush.bf16.msra.mxu2 %v3444_v56 }
 0x5ee   :  { %2627 = vmatpush.bf16.msra.mxu0 %v3715_v62 }
 0x5ef   :  { %3469 = vmatmul.msk.bf16.vlgmr.msrb.gmra.mxu3 %vm211_vm0, %v1980_v53 }
 0x5f0   :  { %2425 = vmatpush.bf16.msra.mxu3 %v3308_v48  ;;  %3470 = vmatmul.msk.bf16.vlgmr.msra.gmra.mxu2 %vm211_vm0, %v1980_v53 }
 0x5f2   :  { %2628 = vmatpush.bf16.msra.mxu0 %v3714_v0 }
 0x5f4   :  { %2426 = vmatpush.bf16.msra.mxu3 %v3300_v39  ;;  %v1968_v39 = vld [vmem:[%s5092_s7] sm:$0x3] }
 0x5f5   :  { %v1970_v53 = vperm.slane %v1968_v39, 0  ;;  %v1971_v8 = vperm.slane %v1968_v39, 1 }
 0x5f6   :  { %2629 = vmatpush.bf16.msra.mxu0 %v3713_v35 }
 0x5f8   :  { %2427 = vmatpush.bf16.msra.mxu3 %v3292_v1 }
 0x5fa   :  { %2630 = vmatpush.bf16.msra.mxu0 %v3712_v19 }
 0x5fc   :  { %2428 = vmatpush.bf16.msra.mxu3 %v3284_v29 }
 0x5fe   :  { %2631 = vmatpush.bf16.msra.mxu0 %v3711_v37 }
 0x600   :  { %2429 = vmatpush.bf16.msra.mxu3 %v3276_v52 }
 0x604   :  { %2430 = vmatpush.bf16.msra.mxu3 %v3268_v10 }
 0x608   :  { %2431 = vmatpush.bf16.msra.mxu3 %v3260_v12  ;;  %v3710_v12 = vld [vmem:[%s5093_s8 + $0x48] sm:$0xff] }
 0x609   :  { %2632 = vmatpush.bf16.msra.mxu0 %v3710_v12 }
 0x60c   :  { %2432 = vmatpush.bf16.msra.mxu3 %v3252_v18 }
 0x60d   :  { %2633 = vmatpush.bf16.msra.mxu0 %v3709_v27 }
 0x60f   :  { %2433 = vmatmul.bf16.vlgmr.msra.gmra.mxu3 %v4806_v7  ;;  %v3401_v7 = vld [vmem:[%s5091_s6 + $0x1b8] sm:$0xf0] }
 0x610   :  { %2451 = vmatpush.bf16.msrb.mxu3 %v3436_v23  ;;  %v3404_v36 = vor.u32 %v3683_v6, %v3401_v7  ;;  %v2643_v7 = vld [vmem:[%s5095_s10 + $0x18] sm:$0xff] }
 0x611   :  { %2663 = vmatpush.msrb.mxu2 %v2643_v7 }
 0x614   :  { %2452 = vmatpush.bf16.msrb.mxu3 %v3428_v28 }
 0x618   :  { %2453 = vmatpush.bf16.msrb.mxu3 %v3420_v33 }
 0x61c   :  { %2454 = vmatpush.bf16.msrb.mxu3 %v3412_v34 }
 0x620   :  { %2455 = vmatpush.bf16.msrb.mxu3 %v3404_v36  ;;  %v2642_v36 = vld [vmem:[%s5095_s10 + $0x10] sm:$0xff] }
 0x621   :  { %2664 = vmatpush.msrb.mxu2 %v2642_v36 }
 0x623   :  { %2665 = vmatpush.msrb.mxu2 %v2641_v14 }
 0x624   :  { %2456 = vmatpush.bf16.msrb.mxu3 %v3396_v13 }
 0x625   :  { %2666 = vmatpush.msrb.mxu2 %v2640_v41 }
 0x627   :  { %2695 = vmatpush.msra.mxu2 %v2679_v11 }
 0x628   :  { %2457 = vmatpush.bf16.msrb.mxu3 %v3388_v42  ;;  %v2678_v42 = vld [vmem:[%s5097_s12 + $0x30] sm:$0xff] }
 0x629   :  { %2696 = vmatpush.msra.mxu2 %v2678_v42 }
 0x62b   :  { %2697 = vmatpush.msra.mxu2 %v2677_v49 }
 0x62c   :  { %2458 = vmatpush.bf16.msrb.mxu3 %v3380_v44  ;;  %v2675_v44 = vld [vmem:[%s5097_s12 + $0x18] sm:$0xff] }
 0x62d   :  { %2698 = vmatpush.msra.mxu2 %v2676_v5 }
 0x62f   :  { %2459 = vmatmul.bf16.vlgmr.msrb.gmra.mxu3 %v4755_v59  ;;  %v3705_v59 = vld [vmem:[%s5093_s8 + $0x20] sm:$0xff]  ;;  %2699 = vmatpush.msra.mxu2 %v2675_v44  ;;  %s2740_s8 = sshll.u32 %s5099_s14, 4  ;;  %s2741_s8 = int_to_ptr.hbm [resolvable:$true] %s2740_s8 }
 0x630   :  { %2613 = vmatpush.bf16.msra.mxu3 %v3708_v25  ;;  %v3741_v25 = vld [vmem:[%s5094_s9] ss:$0 sm:$0xff] }
 0x634   :  { %2614 = vmatpush.bf16.msra.mxu3 %v3707_v15 }
 0x638   :  { %2615 = vmatpush.bf16.msra.mxu3 %v3706_v47 }
 0x63c   :  { %2616 = vmatpush.bf16.msra.mxu3 %v3705_v59 }
 0x640   :  { %2617 = vmatpush.bf16.msra.mxu3 %v3704_v3  ;;  %v2672_v3 = vld [vmem:[%s5097_s12] sm:$0xff] }
 0x642   :  { %v2356_v4 = vpop.f32.mrf.mxu3 }
 0x643   :  { %v2395_v38 = vpop.f32.mrf.mxu2  ;;  %v2357_v1 = vadd.f32 %v2356_v4, %v1970_v53 }
 0x644   :  { %2618 = vmatpush.bf16.msra.mxu3 %v3703_v60 }
 0x648   :  { %2619 = vmatpush.bf16.msra.mxu3 %v3702_v54  ;;  %v3743_v54 = vld [vmem:[%s5098_s13] ss:$0 sm:$0xff] }
 0x64a   :  { %v2358_v46 = vpop.f32.mrf.mxu3 }
 0x64b   :  { %v2397_v9 = vpop.f32.mrf.mxu2  ;;  %v2674_v46 = vld [vmem:[%s5097_s12 + $0x10] sm:$0xff] }
 0x64c   :  { %2620 = vmatpush.bf16.msra.mxu3 %v3701_v31  ;;  %2700 = vmatpush.msra.mxu2 %v2674_v46  ;;  %v2673_v9 = vld [vmem:[%s5097_s12 + $0x8] sm:$0xff]  ;;  %s2738_s12 = sshll.u32 %s3777_s11, 4  ;;  %s2739_s12 = int_to_ptr.vmem [resolvable:$true] %s2738_s12 }
 0x64e   :  { %2701 = vmatpush.msra.mxu2 %v2673_v9 }
 0x650   :  { %2702 = vmatpush.msra.mxu2 %v2672_v3 }
 0x652   :  { %v2369_v45 = vpop.f32.mrf.mxu3 }
 0x653   :  { %v2421_v26 = vpop.f32.mrf.mxu2  ;;  %v2370_v29 = vadd.f32 %v2369_v45, %v2357_v1 }
 0x654   :  { %v2422_v18 = vadd.f32 %v2421_v26, %v1971_v8 }
 0x65a   :  { %v2371_v56 = vpop.f32.mrf.mxu3 }
 0x65b   :  { %v2423_v48 = vpop.f32.mrf.mxu2 }
 0x662   :  { %v2382_v40 = vpop.f32.mrf.mxu3 }
 0x663   :  { %v2447_v51 = vpop.f32.mrf.mxu2  ;;  %v2383_v16 = vadd.f32 %v2382_v40, %v2370_v29 }
 0x665   :  { %v2396_v52 = vadd.f32 %v2395_v38, %v2383_v16 }
 0x66a   :  { %v2384_v58 = vpop.f32.mrf.mxu3 }
 0x66b   :  { %v2449_v30 = vpop.f32.mrf.mxu2 }
 0x672   :  { %v2408_v20 = vpop.f32.mrf.mxu3 }
 0x673   :  { %v2473_v57 = vpop.f32.mrf.mxu2  ;;  %v2409_v10 = vadd.f32 %v2408_v20, %v2396_v52 }
 0x675   :  { %v2477_v63 = vmax.f32 %v2409_v10, 0.0 }
 0x677   :  { %v2479_v17 = vpack.c.bf16 %v2477_v63, %v2477_v63 }
 0x679   :  { %2621 = vmatmul.bf16.vlgmr.msra.gmra.mxu3 %v2479_v17 }
 0x67a   :  { %v2410_v2 = vpop.f32.mrf.mxu3 }
 0x67b   :  { %v2475_v43 = vpop.f32.mrf.mxu2 }
 0x692   :  { %v2434_v23 = vpop.f32.mrf.mxu3 }
 0x693   :  { %v2435_v24 = vadd.f32 %v2434_v23, %v2422_v18 }
 0x695   :  { %v2448_v28 = vadd.f32 %v2447_v51, %v2435_v24 }
 0x69a   :  { %v2436_v55 = vpop.f32.mrf.mxu3 }
 0x6b2   :  { %v2460_v22 = vpop.f32.mrf.mxu3 }
 0x6b3   :  { %v2461_v33 = vadd.f32 %v2460_v22, %v2448_v28 }
 0x6b5   :  { %v2474_v21 = vadd.f32 %v2473_v57, %v2461_v33 }
 0x6b7   :  { %v2478_v32 = vmax.f32 %v2474_v21, 0.0 }
 0x6b9   :  { %v2480_v34 = vpack.c.bf16 %v2478_v32, %v2478_v32 }
 0x6ba   :  { %v2462_v6 = vpop.f32.mrf.mxu3 }
 0x6bb   :  { %2634 = vmatmul.bf16.vlgmr.msra.gmra.mxu0 %v2480_v34 }
 0x6fc   :  { %v2622_v61 = vpop.f32.mrf.mxu3 }
 0x6fd   :  { %v2623_v15 = vadd.f32 %v3741_v25, %v2622_v61 }
 0x704   :  { %v2624_v13 = vpop.f32.mrf.mxu3 }
 0x738   :  { %v2635_v4 = vpop.f32.mrf.mxu0 }
 0x739   :  { %v2636_v38 = vadd.f32 %v2635_v4, %v2623_v15 }
 0x73b   :  { %v2639_v47 = vmax.f32 %v2636_v38, 0.0 }
 0x73d   :  { %3535 = vmatmul.msk.f32.vlgmr.msrb.gmra.mxu2 %vm1676_vm7, %v2639_v47 }
 0x740   :  { %v2637_v59 = vpop.f32.mrf.mxu0 }
 0x7c0   :  { %v2668_v60 = vpop.f32.mrf.mxu2 }
 0x7c1   :  { %v2669_v45 = vadd.f32 %v3742_v50, %v2668_v60 }
 0x7c3   :  { %v2671_v26 = vmax.f32 %v2669_v45, 0.0 }
 0x7c5   :  { %3536 = vmatmul.msk.f32.vlgmr.msra.gmra.mxu2 %vm211_vm0, %v2671_v26 }
 0x848   :  { %v2704_v31 = vpop.f32.mrf.mxu2 }
 0x849   :  { %v2705_v62 = vadd.f32 %v3743_v54, %v2704_v31 }
 0x84b   :  { %v2708_v56 = vsel %vm2707_vm11, %v2705_v62, -inf }
 0x84c   :  { %2709 = vmax.xlane.f32.xlu1 %v2708_v56 }
 0x8bf   :  { %v2710_v48 = vpop.xlane.xlu1 %2709 }
 0x8c0   :  { %v2711_v0 = vsub.f32 %v2705_v62, %v2710_v48 }
 0x8c2   :  { %v2712_v35 = vmul.f32 1.442695, %v2711_v0 }
 0x8c4   :  { %3744 = vpow2.f32 %v2712_v35 }
 0x8ca   :  { %v3745_v39 = vpop.eup %3744 }
 0x8cb   :  { %v2714_v40 = vsel %vm2707_vm11, %v3745_v39, 0.0 }
 0x8cc   :  { %2715 = vadd.xlane.f32.xlu2 %v2714_v40 }
 0x93f   :  { %v2716_v51 = vpop.xlane.xlu2 %2715 }
 0x940   :  { %3746 = vrcp.f32 %v2716_v51  ;;  %v2728_v30 = vand.u32 2147483648, %v2716_v51  ;;  %v2726_v16 = vand.u32 2147483647, %v2716_v51  ;;  %vm2722_vm13 = vweird.f32 %v2716_v51 }
 0x942   :  { %v2729_v52 = vor.u32 1.1754944e-38, %v2728_v30  ;;  %vm2727_vm15 = vcmp.eq.f32.partialorder %v2726_v16, 8.507059e+37 }
 0x946   :  { %v3747_v53 = vpop.eup %3746 }
 0x947   :  { %v2718_v1 = vmul.f32 %v3747_v53, %v2716_v51  ;;  %vm2723_vm12 = vweird.f32 %v3747_v53 }
 0x948   :  { %vm2724_vm14 = vmor %vm2722_vm13, %vm2723_vm12 }
 0x949   :  { %v2719_v58 = vsub.f32 1.0, %v2718_v1 }
 0x94b   :  { %v2720_v29 = vmul.f32 %v3747_v53, %v2719_v58 }
 0x94d   :  { %v2721_v19 = vadd.f32 %v3747_v53, %v2720_v29 }
 0x94f   :  { %v2725_v20 = vsel %vm2724_vm14, %v3747_v53, %v2721_v19 }
 0x950   :  { %v2730_v57 = vsel %vm2727_vm15, %v2729_v52, %v2725_v20 }
 0x951   :  { %v2731_v10 = vmul.f32 %v3745_v39, %v2730_v57 }
 0x953   :  { %2732 = vst.msk [vmem:[#allocation4] sm:$0x3] %vm2707_vm11, %v2731_v10 }
 0x954   :  { %2743 = dma.vmem_to_hbm [thread:$0]  %s2739_s12, 32, %s2741_s8, [#allocation5]  }
 0x955   :  { %3772 = dma.done.wait [#allocation5], 32  }
 0x956   :  { %3773 = vsyncadd [#allocation5], 4294967264 }
 0x957   :  { %2748 = vsyncpa [#allocation5], 1 }

</bundles_post_ra>
